<compile_context>
chip_gen: v5e
topology: v5e:2x2
jax: 0.10.0
libtpu: 0.0.40
codegen_flags: <defaults>
</compile_context>

<pallas_src>
import functools

import jax
import jax.numpy as jnp
import numpy as np
from jax import lax
from jax.experimental import pallas as pl
from jax.experimental.pallas import tpu as pltpu

EPS = 1e-5
LANE = 128     # vreg lane width / MXU column quantum
SUBLANE = 8    # f32 sublane quantum


def _round_up(x, m):
    return ((x + m - 1) // m) * m


def _pad_axis(a, size, axis):
    pad = size - a.shape[axis]
    if pad == 0:
        return a
    cfg = [(0, 0)] * a.ndim
    cfg[axis] = (0, pad)
    return jnp.pad(a, cfg)


# ---------------------------------------------------------------------------
# Kernel 1: tiled fused matmul  out = act((X @ W) * scale + bias [+ residual])
# ---------------------------------------------------------------------------
def _matmul_bn_act_kernel(x_ref, w_ref, s_ref, b_ref, *rest, relu, add_residual):
    if add_residual:
        r_ref, o_ref, acc_ref = rest
    else:
        o_ref, acc_ref = rest
    k = pl.program_id(2)

    @pl.when(k == 0)
    def _init():
        acc_ref[...] = jnp.zeros_like(acc_ref)

    acc_ref[...] += jnp.dot(x_ref[...], w_ref[...],
                            preferred_element_type=jnp.float32)

    @pl.when(k == pl.num_programs(2) - 1)
    def _epilogue():
        out = acc_ref[...] * s_ref[...] + b_ref[...]
        if add_residual:
            out = out + r_ref[...].astype(jnp.float32)
        if relu:
            out = jnp.maximum(out, 0.0)
        o_ref[...] = out.astype(o_ref.dtype)


def fused_matmul_bn(x_mat, w_mat, scale, bias, *, relu=True, residual=None,
                    out_dtype=jnp.bfloat16, tm=512, tn=256, tk=256):
    """x: (M, K), w: (K, N), scale/bias: (N,), residual: (M, N) or None."""
    M, K = x_mat.shape
    K2, N = w_mat.shape
    assert K == K2 and scale.shape[-1] == N and bias.shape[-1] == N

    # Shrink tiles for small problems, keep lane/sublane alignment, then pad.
    tm = min(tm, _round_up(M, SUBLANE))
    tk = min(tk, _round_up(K, LANE))
    tn = min(tn, _round_up(N, LANE))
    Mp, Kp, Np = _round_up(M, tm), _round_up(K, tk), _round_up(N, tn)

    x_p = _pad_axis(_pad_axis(x_mat, Mp, 0), Kp, 1).astype(jnp.bfloat16)
    w_p = _pad_axis(_pad_axis(w_mat, Kp, 0), Np, 1).astype(jnp.bfloat16)
    s_p = _pad_axis(jnp.reshape(scale, (1, N)).astype(jnp.float32), Np, 1)
    b_p = _pad_axis(jnp.reshape(bias, (1, N)).astype(jnp.float32), Np, 1)

    grid = (Mp // tm, Np // tn, Kp // tk)
    in_specs = [
        pl.BlockSpec((tm, tk), lambda i, j, k: (i, k)),
        pl.BlockSpec((tk, tn), lambda i, j, k: (k, j)),
        pl.BlockSpec((1, tn), lambda i, j, k: (0, j)),
        pl.BlockSpec((1, tn), lambda i, j, k: (0, j)),
    ]
    args = [x_p, w_p, s_p, b_p]
    if residual is not None:
        r_p = _pad_axis(_pad_axis(residual, Mp, 0), Np, 1).astype(jnp.bfloat16)
        in_specs.append(pl.BlockSpec((tm, tn), lambda i, j, k: (i, j)))
        args.append(r_p)

    bytes_accessed = int(sum(a.size * a.dtype.itemsize for a in args)
                         + Mp * Np * jnp.dtype(out_dtype).itemsize)
    kernel = functools.partial(_matmul_bn_act_kernel, relu=relu,
                               add_residual=residual is not None)
    out = pl.pallas_call(
        kernel,
        out_shape=jax.ShapeDtypeStruct((Mp, Np), out_dtype),
        grid_spec=pltpu.PrefetchScalarGridSpec(
            num_scalar_prefetch=0,
            grid=grid,
            in_specs=in_specs,
            out_specs=pl.BlockSpec((tm, tn), lambda i, j, k: (i, j)),
            scratch_shapes=[pltpu.VMEM((tm, tn), jnp.float32)],
        ),
        compiler_params=pltpu.CompilerParams(
            dimension_semantics=("parallel", "parallel", "arbitrary"),
            vmem_limit_bytes=32 * 1024 * 1024,
        ),
        cost_estimate=pl.CostEstimate(flops=2 * Mp * Np * Kp,
                                      transcendentals=0,
                                      bytes_accessed=bytes_accessed),
    )(*args)
    if (Mp, Np) != (M, N):
        out = out[:M, :N]
    return out


# ---------------------------------------------------------------------------
# Kernel 2: direct 3x3 conv (padding=1, stride s) + folded BN + ReLU, NHWC.
# No im2col materialization: the 9 taps are accumulated on the MXU inside the
# kernel from a VMEM-resident, phase-decomposed activation slab.
# ---------------------------------------------------------------------------
def _conv3x3_bn_relu_kernel(x_ref, w_ref, s_ref, b_ref, o_ref, *, stride, wout):
    # x_ref : (s*s, Hph, Wph, C)  phase-decomposed padded activation (one image)
    # w_ref : (9, C, tn)          per-tap weights, tap = dy*3 + dx
    # s_ref, b_ref : (1, tn)      folded BN scale / bias
    # o_ref : (1, 1, wout, tn)    one output row, lane-dense channels
    h = pl.program_id(1)                      # output row index
    acc = jnp.zeros((wout, w_ref.shape[-1]), jnp.float32)
    for dy in range(3):
        for dx in range(3):
            ph = (dy % stride) * stride + (dx % stride)
            ry, rx = dy // stride, dx // stride
            row = x_ref[ph, h + ry, rx:rx + wout, :]           # (wout, C) bf16
            acc = acc + jnp.dot(row, w_ref[dy * 3 + dx],
                                preferred_element_type=jnp.float32)
    out = acc * s_ref[...] + b_ref[...]
    o_ref[0, 0] = jnp.maximum(out, 0.0).astype(o_ref.dtype)


def conv3x3_bn_relu(x_nhwc, w_taps, scale, bias, stride, *, tn=256):
    """x: (B,H,W,C) (C lane-padded), w_taps: (9,C,N), scale/bias: (N,)."""
    B, H, W, C = x_nhwc.shape
    ntaps, C2, N = w_taps.shape
    assert ntaps == 9 and C2 == C
    s = stride
    Hout = (H + 2 - 3) // s + 1
    Wout = (W + 2 - 3) // s + 1

    # Zero-pad by 1 (conv padding) and up to a multiple of the stride, then
    # split into s*s contiguous phase images: phase (p, q) = xpad[:, p::s, q::s].
    # Tap (dy, dx) then reads a contiguous (Hout, Wout) window of phase
    # (dy % s, dx % s) at static offset (dy // s, dx // s): no strided access
    # inside the kernel and no 9x im2col blow-up in HBM.
    Hp = _round_up(H + 2, s)
    Wp = _round_up(W + 2, s)
    xpad = jnp.pad(x_nhwc, ((0, 0), (1, Hp - H - 1), (1, Wp - W - 1), (0, 0)))
    if s == 1:
        phases = xpad[:, None]
    else:
        phases = jnp.stack([xpad[:, p::s, q::s, :]
                            for p in range(s) for q in range(s)], axis=1)
    s2, Hph, Wph = phases.shape[1], phases.shape[2], phases.shape[3]
    phases = phases.reshape(B * s2, Hph, Wph, C).astype(jnp.bfloat16)

    tn = min(tn, N)
    if N % tn:
        tn = LANE
    grid = (B, Hout, N // tn)
    kernel = functools.partial(_conv3x3_bn_relu_kernel, stride=s, wout=Wout)
    s_p = jnp.reshape(scale, (1, N)).astype(jnp.float32)
    b_p = jnp.reshape(bias, (1, N)).astype(jnp.float32)
    w_p = w_taps.astype(jnp.bfloat16)

    out = pl.pallas_call(
        kernel,
        out_shape=jax.ShapeDtypeStruct((B, Hout, Wout, N), jnp.bfloat16),
        grid_spec=pltpu.PrefetchScalarGridSpec(
            num_scalar_prefetch=0,
            grid=grid,
            in_specs=[
                pl.BlockSpec((s2, Hph, Wph, C), lambda b, h, j: (b, 0, 0, 0)),
                pl.BlockSpec((9, C, tn), lambda b, h, j: (0, 0, j)),
                pl.BlockSpec((1, tn), lambda b, h, j: (0, j)),
                pl.BlockSpec((1, tn), lambda b, h, j: (0, j)),
            ],
            out_specs=pl.BlockSpec((1, 1, Wout, tn),
                                   lambda b, h, j: (b, h, 0, j)),
        ),
        compiler_params=pltpu.CompilerParams(
            dimension_semantics=("parallel", "parallel", "parallel"),
            vmem_limit_bytes=32 * 1024 * 1024,
        ),
        cost_estimate=pl.CostEstimate(
            flops=2 * B * Hout * Wout * 9 * C * N,
            transcendentals=0,
            bytes_accessed=int(phases.size * 2 + w_p.size * 2
                               + B * Hout * Wout * N * 2)),
    )(phases, w_p, s_p, b_p)
    return out, Hout, Wout


# ---------------------------------------------------------------------------
# Bottleneck forward (inference-mode BN folded into scale/bias)
# ---------------------------------------------------------------------------
def bn_fold(bn):
    gamma, beta, mean, var = bn
    scale = gamma / jnp.sqrt(var + EPS)
    return scale, beta - mean * scale


def bottleneck_forward(x_nchw, params, stride):
    # NCHW -> NHWC once at the module boundary.
    # TODO(synk): in a full network keep NHWC end-to-end and fold these
    # boundary transposes into neighboring kernels instead of XLA copies.
    x = jnp.transpose(x_nchw, (0, 2, 3, 1))
    B, H, W, Cin = x.shape
    planes = params["conv1_w"].shape[0]
    exp = 4 * planes
    has_proj = (stride != 1) or (Cin != exp)

    # Lane-pad every channel dim once; slice padding off once at the end.
    Cin_p = _round_up(Cin, LANE)
    P_p = _round_up(planes, LANE)
    E_p = _round_up(exp, LANE)
    x_p = _pad_axis(x, Cin_p, 3).astype(jnp.bfloat16)           # (B,H,W,Cin_p)

    # stage 1: 1x1 conv + bn1 + relu  (fused tiled matmul)
    w1 = jnp.transpose(params["conv1_w"][:, :, 0, 0])            # (Cin, planes)
    w1 = _pad_axis(_pad_axis(w1, Cin_p, 0), P_p, 1)
    s1, b1 = bn_fold(params["bn1"])
    out1 = fused_matmul_bn(x_p.reshape(B * H * W, Cin_p), w1,
                           _pad_axis(s1, P_p, 0), _pad_axis(b1, P_p, 0),
                           relu=True)
    out1 = out1.reshape(B, H, W, P_p)

    # stage 2: 3x3 conv (stride, pad=1) + bn2 + relu  (direct conv kernel)
    w2 = jnp.transpose(params["conv2_w"], (2, 3, 1, 0)).reshape(9, planes, planes)
    w2 = _pad_axis(_pad_axis(w2, P_p, 1), P_p, 2)                # (9, P_p, P_p)
    s2, b2 = bn_fold(params["bn2"])
    out2, Hout, Wout = conv3x3_bn_relu(out1, w2,
                                       _pad_axis(s2, P_p, 0),
                                       _pad_axis(b2, P_p, 0), stride)

    # shortcut branch
    # TODO(synk): the strided 1x1 sampling is still an XLA slice; a manual
    # pl.ANY-ref gather inside the kernel would remove this extra HBM pass.
    xs = x_p[:, ::stride, ::stride, :]                           # (B,Hout,Wout,Cin_p)
    if has_proj:
        ws = jnp.transpose(params["convs_w"][:, :, 0, 0])        # (Cin, exp)
        ws = _pad_axis(_pad_axis(ws, Cin_p, 0), E_p, 1)
        ss, bs = bn_fold(params["bns"])
        shortcut = fused_matmul_bn(xs.reshape(B * Hout * Wout, Cin_p), ws,
                                   _pad_axis(ss, E_p, 0), _pad_axis(bs, E_p, 0),
                                   relu=False)
    else:
        shortcut = xs.reshape(B * Hout * Wout, E_p)

    # stage 3: 1x1 conv + bn3 + residual add + relu  (fully fused epilogue)
    w3 = jnp.transpose(params["conv3_w"][:, :, 0, 0])            # (planes, exp)
    w3 = _pad_axis(_pad_axis(w3, P_p, 0), E_p, 1)
    s3, b3 = bn_fold(params["bn3"])
    out3 = fused_matmul_bn(out2.reshape(B * Hout * Wout, P_p), w3,
                           _pad_axis(s3, E_p, 0), _pad_axis(b3, E_p, 0),
                           relu=True, residual=shortcut, out_dtype=jnp.float32)

    out = out3.reshape(B, Hout, Wout, E_p)[:, :, :, :exp]
    return jnp.transpose(out, (0, 3, 1, 2))                      # -> NCHW


# ---------------------------------------------------------------------------
# Pure-JAX reference (mirrors the PyTorch forward, eval-mode BN)
# ---------------------------------------------------------------------------
def _conv_nchw(x, w, stride=1, padding=0):
    return lax.conv_general_dilated(
        x, w, (stride, stride), [(padding, padding)] * 2,
        dimension_numbers=("NCHW", "OIHW", "NCHW"))


def _bn_nchw(x, bn):
    s, b = bn_fold(bn)
    return x * s[None, :, None, None] + b[None, :, None, None]


def reference(x, params, stride):
    Cin = x.shape[1]
    planes = params["conv1_w"].shape[0]
    has_proj = (stride != 1) or (Cin != 4 * planes)
    out = jax.nn.relu(_bn_nchw(_conv_nchw(x, params["conv1_w"]), params["bn1"]))
    out = jax.nn.relu(_bn_nchw(_conv_nchw(out, params["conv2_w"], stride, 1),
                               params["bn2"]))
    out = _bn_nchw(_conv_nchw(out, params["conv3_w"]), params["bn3"])
    sc = (_bn_nchw(_conv_nchw(x, params["convs_w"], stride), params["bns"])
          if has_proj else x)
    return jax.nn.relu(out + sc)


# ---------------------------------------------------------------------------
# Deterministic parameter construction + driver
# ---------------------------------------------------------------------------
def make_params(key, in_planes, planes):
    exp = 4 * planes
    ks = jax.random.split(key, 8)

    def conv(k, shape):
        return 0.1 * jax.random.normal(k, shape, dtype=jnp.float32)

    def bn(k, c):
        k1, k2, k3, k4 = jax.random.split(k, 4)
        gamma = jax.random.uniform(k1, (c,), jnp.float32, 0.5, 1.5)
        beta = 0.1 * jax.random.normal(k2, (c,), jnp.float32)
        mean = 0.1 * jax.random.normal(k3, (c,), jnp.float32)
        var = jax.random.uniform(k4, (c,), jnp.float32, 0.5, 1.5)
        return (gamma, beta, mean, var)

    return {
        "conv1_w": conv(ks[0], (planes, in_planes, 1, 1)),
        "bn1": bn(ks[1], planes),
        "conv2_w": conv(ks[2], (planes, planes, 3, 3)),
        "bn2": bn(ks[3], planes),
        "conv3_w": conv(ks[4], (exp, planes, 1, 1)),
        "bn3": bn(ks[5], exp),
        "convs_w": conv(ks[6], (exp, in_planes, 1, 1)),
        "bns": bn(ks[7], exp),
    }


if __name__ == "__main__":
    in_planes, planes, stride = 16, 8, 2
    B, H, W = 2, 16, 16

    key = jax.random.PRNGKey(0)
    kx, kp = jax.random.split(key)
    x = jax.random.normal(kx, (B, in_planes, H, W), dtype=jnp.float32)  # NCHW
    params = make_params(kp, in_planes, planes)

    fwd = jax.jit(bottleneck_forward, static_argnums=(2,))
    out = jax.block_until_ready(fwd(x, params, stride))
    ref = jax.block_until_ready(reference(x, params, stride))

    assert out.shape == ref.shape, (out.shape, ref.shape)
    # bf16 MXU inputs -> relaxed tolerance vs the f32 reference.
    if not np.allclose(np.asarray(out), np.asarray(ref), atol=4e-2, rtol=4e-2):
        err = float(np.max(np.abs(np.asarray(out) - np.asarray(ref))))
        raise AssertionError(f"Pallas Bottleneck mismatch vs reference (max abs err {err})")
    print("KERNEL_OK")
</pallas_src>

<mosaic_0001>
module attributes {stable_mosaic.version = 11 : i64} {
  func.func @_matmul_bn_act_kernel(%arg0: i32, %arg1: i32, %arg2: i32, %arg3: memref<512x128xbf16, #tpu.memory_space<vmem>>, %arg4: memref<128x128xbf16, #tpu.memory_space<vmem>>, %arg5: memref<1x128xf32, #tpu.memory_space<vmem>>, %arg6: memref<1x128xf32, #tpu.memory_space<vmem>>, %arg7: memref<512x128xbf16, #tpu.memory_space<vmem>>, %arg8: memref<512x128xf32, #tpu.memory_space<vmem>>) attributes {dimension_semantics = [#tpu.dimension_semantics<parallel>, #tpu.dimension_semantics<parallel>, #tpu.dimension_semantics<arbitrary>], iteration_bounds = array<i64: 1, 1, 1>, scalar_prefetch = 0 : i64, scratch_operands = 1 : i64, tpu.core_type = #tpu.core_type<tc>, window_params = [{transform_indices = @transform_0, window_bounds = array<i64: 512, 128>}, {transform_indices = @transform_1, window_bounds = array<i64: 128, 128>}, {transform_indices = @transform_2, window_bounds = array<i64: 1, 128>}, {transform_indices = @transform_3, window_bounds = array<i64: 1, 128>}, {transform_indices = @transform_4, window_bounds = array<i64: 512, 128>}]} {
    %c0_i32 = arith.constant 0 : i32
    %0 = arith.cmpi eq, %arg2, %c0_i32 : i32
    %1 = arith.extui %0 : i1 to i32
    %c0_i32_0 = arith.constant 0 : i32
    %2 = arith.cmpi ne, %1, %c0_i32_0 : i32
    scf.if %2 {
      %cst_10 = arith.constant 0.000000e+00 : f32
      %12 = vector.broadcast %cst_10 : f32 to vector<512x128xf32>
      %c0_11 = arith.constant 0 : index
      %c0_12 = arith.constant 0 : index
      %13 = vector.load %arg8[%c0_11, %c0_12] : memref<512x128xf32, #tpu.memory_space<vmem>>, vector<512x128xf32>
      tpu.vector_store %arg8[%c0_11, %c0_12], %12 {strides = array<i32>} : memref<512x128xf32, #tpu.memory_space<vmem>>, vector<512x128xf32>,
    } else {
    }
    %c0 = arith.constant 0 : index
    %c0_1 = arith.constant 0 : index
    %3 = vector.load %arg8[%c0, %c0_1] : memref<512x128xf32, #tpu.memory_space<vmem>>, vector<512x128xf32>
    %c0_2 = arith.constant 0 : index
    %c0_3 = arith.constant 0 : index
    %4 = vector.load %arg3[%c0_2, %c0_3] : memref<512x128xbf16, #tpu.memory_space<vmem>>, vector<512x128xbf16>
    %c0_4 = arith.constant 0 : index
    %c0_5 = arith.constant 0 : index
    %5 = vector.load %arg4[%c0_4, %c0_5] : memref<128x128xbf16, #tpu.memory_space<vmem>>, vector<128x128xbf16>
    %cst = arith.constant dense<0.000000e+00> : vector<512x128xf32>
    %6 = tpu.matmul %4, %5, %cst {dimension_numbers = #tpu.dot_dimension_numbers<[1], [0], [0], [1], [0, 0, 1, 1], [], []>} : vector<512x128xbf16>, vector<128x128xbf16>, vector<512x128xf32> -> vector<512x128xf32>
    %7 = arith.addf %3, %6 : vector<512x128xf32>
    %c0_6 = arith.constant 0 : index
    %c0_7 = arith.constant 0 : index
    %8 = vector.load %arg8[%c0_6, %c0_7] : memref<512x128xf32, #tpu.memory_space<vmem>>, vector<512x128xf32>
    tpu.vector_store %arg8[%c0_6, %c0_7], %7 {strides = array<i32>} : memref<512x128xf32, #tpu.memory_space<vmem>>, vector<512x128xf32>,
    %c0_i32_8 = arith.constant 0 : i32
    %9 = arith.cmpi eq, %arg2, %c0_i32_8 : i32
    %10 = arith.extui %9 : i1 to i32
    %c0_i32_9 = arith.constant 0 : i32
    %11 = arith.cmpi ne, %10, %c0_i32_9 : i32
    scf.if %11 {
      %c0_10 = arith.constant 0 : index
      %c0_11 = arith.constant 0 : index
      %12 = vector.load %arg8[%c0_10, %c0_11] : memref<512x128xf32, #tpu.memory_space<vmem>>, vector<512x128xf32>
      %c0_12 = arith.constant 0 : index
      %c0_13 = arith.constant 0 : index
      %13 = vector.load %arg5[%c0_12, %c0_13] : memref<1x128xf32, #tpu.memory_space<vmem>>, vector<1x128xf32>
      %14 = vector.broadcast %13 : vector<1x128xf32> to vector<512x128xf32>
      %15 = arith.mulf %12, %14 : vector<512x128xf32>
      %c0_14 = arith.constant 0 : index
      %c0_15 = arith.constant 0 : index
      %16 = vector.load %arg6[%c0_14, %c0_15] : memref<1x128xf32, #tpu.memory_space<vmem>>, vector<1x128xf32>
      %17 = vector.broadcast %16 : vector<1x128xf32> to vector<512x128xf32>
      %18 = arith.addf %15, %17 : vector<512x128xf32>
      %cst_16 = arith.constant 0.000000e+00 : f32
      %19 = vector.broadcast %cst_16 : f32 to vector<512x128xf32>
      %20 = arith.maximumf %18, %19 : vector<512x128xf32>
      %21 = arith.truncf %20 : vector<512x128xf32> to vector<512x128xbf16>
      %c0_17 = arith.constant 0 : index
      %c0_18 = arith.constant 0 : index
      %22 = vector.load %arg7[%c0_17, %c0_18] : memref<512x128xbf16, #tpu.memory_space<vmem>>, vector<512x128xbf16>
      tpu.vector_store %arg7[%c0_17, %c0_18], %21 {strides = array<i32>} : memref<512x128xbf16, #tpu.memory_space<vmem>>, vector<512x128xbf16>,
    } else {
    }
    return
  }
  func.func @transform_0(%arg0: i32, %arg1: i32, %arg2: i32) -> (i32, i32) {
    %c0_i32 = arith.constant 0 : i32
    return %arg0, %arg2 : i32, i32
  }
  func.func @transform_1(%arg0: i32, %arg1: i32, %arg2: i32) -> (i32, i32) {
    %c0_i32 = arith.constant 0 : i32
    return %arg2, %arg1 : i32, i32
  }
  func.func @transform_2(%arg0: i32, %arg1: i32, %arg2: i32) -> (i32, i32) {
    %c0_i32 = arith.constant 0 : i32
    %c0_i32_0 = arith.constant 0 : i32
    return %c0_i32, %arg1 : i32, i32
  }
  func.func @transform_3(%arg0: i32, %arg1: i32, %arg2: i32) -> (i32, i32) {
    %c0_i32 = arith.constant 0 : i32
    %c0_i32_0 = arith.constant 0 : i32
    return %c0_i32, %arg1 : i32, i32
  }
  func.func @transform_4(%arg0: i32, %arg1: i32, %arg2: i32) -> (i32, i32) {
    %c0_i32 = arith.constant 0 : i32
    return %arg0, %arg1 : i32, i32
  }
}

module attributes {stable_mosaic.version = 11 : i64} {
  func.func @_conv3x3_bn_relu_kernel(%arg0: i32, %arg1: i32, %arg2: i32, %arg3: memref<4x9x9x128xbf16, #tpu.memory_space<vmem>>, %arg4: memref<9x128x128xbf16, #tpu.memory_space<vmem>>, %arg5: memref<1x128xf32, #tpu.memory_space<vmem>>, %arg6: memref<1x128xf32, #tpu.memory_space<vmem>>, %arg7: memref<1x1x8x128xbf16, #tpu.memory_space<vmem>>) attributes {dimension_semantics = [#tpu.dimension_semantics<parallel>, #tpu.dimension_semantics<parallel>, #tpu.dimension_semantics<parallel>], iteration_bounds = array<i64: 2, 8, 1>, scalar_prefetch = 0 : i64, scratch_operands = 0 : i64, tpu.core_type = #tpu.core_type<tc>, window_params = [{transform_indices = @transform_0, window_bounds = array<i64: 4, 9, 9, 128>}, {transform_indices = @transform_1, window_bounds = array<i64: 9, 128, 128>}, {transform_indices = @transform_2, window_bounds = array<i64: 1, 128>}, {transform_indices = @transform_3, window_bounds = array<i64: 1, 128>}, {transform_indices = @transform_4, window_bounds = array<i64: 1, 1, 8, 128>}]} {
    %cst = arith.constant 0.000000e+00 : f32
    %0 = vector.broadcast %cst : f32 to vector<8x128xf32>
    %c0_i32 = arith.constant 0 : i32
    %1 = arith.addi %arg1, %c0_i32 : i32
    %c0 = arith.constant 0 : index
    %2 = arith.index_cast %1 : i32 to index
    %c0_0 = arith.constant 0 : index
    %c0_1 = arith.constant 0 : index
    %3 = vector.load %arg3[%c0, %2, %c0_0, %c0_1] : memref<4x9x9x128xbf16, #tpu.memory_space<vmem>>, vector<1x1x8x128xbf16>
    %4 = vector.shape_cast %3 : vector<1x1x8x128xbf16> to vector<8x128xbf16>
    %c0_2 = arith.constant 0 : index
    %c0_3 = arith.constant 0 : index
    %c0_4 = arith.constant 0 : index
    %5 = vector.load %arg4[%c0_2, %c0_3, %c0_4] : memref<9x128x128xbf16, #tpu.memory_space<vmem>>, vector<1x128x128xbf16>
    %6 = vector.shape_cast %5 : vector<1x128x128xbf16> to vector<128x128xbf16>
    %cst_5 = arith.constant dense<0.000000e+00> : vector<8x128xf32>
    %7 = tpu.matmul %4, %6, %cst_5 {dimension_numbers = #tpu.dot_dimension_numbers<[1], [0], [0], [1], [0, 0, 1, 1], [], []>} : vector<8x128xbf16>, vector<128x128xbf16>, vector<8x128xf32> -> vector<8x128xf32>
    %8 = arith.addf %0, %7 : vector<8x128xf32>
    %c0_i32_6 = arith.constant 0 : i32
    %9 = arith.addi %arg1, %c0_i32_6 : i32
    %c1 = arith.constant 1 : index
    %10 = arith.index_cast %9 : i32 to index
    %c0_7 = arith.constant 0 : index
    %c0_8 = arith.constant 0 : index
    %11 = vector.load %arg3[%c1, %10, %c0_7, %c0_8] : memref<4x9x9x128xbf16, #tpu.memory_space<vmem>>, vector<1x1x8x128xbf16>
    %12 = vector.shape_cast %11 : vector<1x1x8x128xbf16> to vector<8x128xbf16>
    %c1_9 = arith.constant 1 : index
    %c0_10 = arith.constant 0 : index
    %c0_11 = arith.constant 0 : index
    %13 = vector.load %arg4[%c1_9, %c0_10, %c0_11] : memref<9x128x128xbf16, #tpu.memory_space<vmem>>, vector<1x128x128xbf16>
    %14 = vector.shape_cast %13 : vector<1x128x128xbf16> to vector<128x128xbf16>
    %cst_12 = arith.constant dense<0.000000e+00> : vector<8x128xf32>
    %15 = tpu.matmul %12, %14, %cst_12 {dimension_numbers = #tpu.dot_dimension_numbers<[1], [0], [0], [1], [0, 0, 1, 1], [], []>} : vector<8x128xbf16>, vector<128x128xbf16>, vector<8x128xf32> -> vector<8x128xf32>
    %16 = arith.addf %8, %15 : vector<8x128xf32>
    %c0_i32_13 = arith.constant 0 : i32
    %17 = arith.addi %arg1, %c0_i32_13 : i32
    %c0_14 = arith.constant 0 : index
    %18 = arith.index_cast %17 : i32 to index
    %c1_15 = arith.constant 1 : index
    %c0_16 = arith.constant 0 : index
    %19 = vector.load %arg3[%c0_14, %18, %c1_15, %c0_16] : memref<4x9x9x128xbf16, #tpu.memory_space<vmem>>, vector<1x1x8x128xbf16>
    %20 = vector.shape_cast %19 : vector<1x1x8x128xbf16> to vector<8x128xbf16>
    %c2 = arith.constant 2 : index
    %c0_17 = arith.constant 0 : index
    %c0_18 = arith.constant 0 : index
    %21 = vector.load %arg4[%c2, %c0_17, %c0_18] : memref<9x128x128xbf16, #tpu.memory_space<vmem>>, vector<1x128x128xbf16>
    %22 = vector.shape_cast %21 : vector<1x128x128xbf16> to vector<128x128xbf16>
    %cst_19 = arith.constant dense<0.000000e+00> : vector<8x128xf32>
    %23 = tpu.matmul %20, %22, %cst_19 {dimension_numbers = #tpu.dot_dimension_numbers<[1], [0], [0], [1], [0, 0, 1, 1], [], []>} : vector<8x128xbf16>, vector<128x128xbf16>, vector<8x128xf32> -> vector<8x128xf32>
    %24 = arith.addf %16, %23 : vector<8x128xf32>
    %c0_i32_20 = arith.constant 0 : i32
    %25 = arith.addi %arg1, %c0_i32_20 : i32
    %c2_21 = arith.constant 2 : index
    %26 = arith.index_cast %25 : i32 to index
    %c0_22 = arith.constant 0 : index
    %c0_23 = arith.constant 0 : index
    %27 = vector.load %arg3[%c2_21, %26, %c0_22, %c0_23] : memref<4x9x9x128xbf16, #tpu.memory_space<vmem>>, vector<1x1x8x128xbf16>
    %28 = vector.shape_cast %27 : vector<1x1x8x128xbf16> to vector<8x128xbf16>
    %c3 = arith.constant 3 : index
    %c0_24 = arith.constant 0 : index
    %c0_25 = arith.constant 0 : index
    %29 = vector.load %arg4[%c3, %c0_24, %c0_25] : memref<9x128x128xbf16, #tpu.memory_space<vmem>>, vector<1x128x128xbf16>
    %30 = vector.shape_cast %29 : vector<1x128x128xbf16> to vector<128x128xbf16>
    %cst_26 = arith.constant dense<0.000000e+00> : vector<8x128xf32>
    %31 = tpu.matmul %28, %30, %cst_26 {dimension_numbers = #tpu.dot_dimension_numbers<[1], [0], [0], [1], [0, 0, 1, 1], [], []>} : vector<8x128xbf16>, vector<128x128xbf16>, vector<8x128xf32> -> vector<8x128xf32>
    %32 = arith.addf %24, %31 : vector<8x128xf32>
    %c0_i32_27 = arith.constant 0 : i32
    %33 = arith.addi %arg1, %c0_i32_27 : i32
    %c3_28 = arith.constant 3 : index
    %34 = arith.index_cast %33 : i32 to index
    %c0_29 = arith.constant 0 : index
    %c0_30 = arith.constant 0 : index
    %35 = vector.load %arg3[%c3_28, %34, %c0_29, %c0_30] : memref<4x9x9x128xbf16, #tpu.memory_space<vmem>>, vector<1x1x8x128xbf16>
    %36 = vector.shape_cast %35 : vector<1x1x8x128xbf16> to vector<8x128xbf16>
    %c4 = arith.constant 4 : index
    %c0_31 = arith.constant 0 : index
    %c0_32 = arith.constant 0 : index
    %37 = vector.load %arg4[%c4, %c0_31, %c0_32] : memref<9x128x128xbf16, #tpu.memory_space<vmem>>, vector<1x128x128xbf16>
    %38 = vector.shape_cast %37 : vector<1x128x128xbf16> to vector<128x128xbf16>
    %cst_33 = arith.constant dense<0.000000e+00> : vector<8x128xf32>
    %39 = tpu.matmul %36, %38, %cst_33 {dimension_numbers = #tpu.dot_dimension_numbers<[1], [0], [0], [1], [0, 0, 1, 1], [], []>} : vector<8x128xbf16>, vector<128x128xbf16>, vector<8x128xf32> -> vector<8x128xf32>
    %40 = arith.addf %32, %39 : vector<8x128xf32>
    %c0_i32_34 = arith.constant 0 : i32
    %41 = arith.addi %arg1, %c0_i32_34 : i32
    %c2_35 = arith.constant 2 : index
    %42 = arith.index_cast %41 : i32 to index
    %c1_36 = arith.constant 1 : index
    %c0_37 = arith.constant 0 : index
    %43 = vector.load %arg3[%c2_35, %42, %c1_36, %c0_37] : memref<4x9x9x128xbf16, #tpu.memory_space<vmem>>, vector<1x1x8x128xbf16>
    %44 = vector.shape_cast %43 : vector<1x1x8x128xbf16> to vector<8x128xbf16>
    %c5 = arith.constant 5 : index
    %c0_38 = arith.constant 0 : index
    %c0_39 = arith.constant 0 : index
    %45 = vector.load %arg4[%c5, %c0_38, %c0_39] : memref<9x128x128xbf16, #tpu.memory_space<vmem>>, vector<1x128x128xbf16>
    %46 = vector.shape_cast %45 : vector<1x128x128xbf16> to vector<128x128xbf16>
    %cst_40 = arith.constant dense<0.000000e+00> : vector<8x128xf32>
    %47 = tpu.matmul %44, %46, %cst_40 {dimension_numbers = #tpu.dot_dimension_numbers<[1], [0], [0], [1], [0, 0, 1, 1], [], []>} : vector<8x128xbf16>, vector<128x128xbf16>, vector<8x128xf32> -> vector<8x128xf32>
    %48 = arith.addf %40, %47 : vector<8x128xf32>
    %c1_i32 = arith.constant 1 : i32
    %49 = arith.addi %arg1, %c1_i32 : i32
    %c0_41 = arith.constant 0 : index
    %50 = arith.index_cast %49 : i32 to index
    %c0_42 = arith.constant 0 : index
    %c0_43 = arith.constant 0 : index
    %51 = vector.load %arg3[%c0_41, %50, %c0_42, %c0_43] : memref<4x9x9x128xbf16, #tpu.memory_space<vmem>>, vector<1x1x8x128xbf16>
    %52 = vector.shape_cast %51 : vector<1x1x8x128xbf16> to vector<8x128xbf16>
    %c6 = arith.constant 6 : index
    %c0_44 = arith.constant 0 : index
    %c0_45 = arith.constant 0 : index
    %53 = vector.load %arg4[%c6, %c0_44, %c0_45] : memref<9x128x128xbf16, #tpu.memory_space<vmem>>, vector<1x128x128xbf16>
    %54 = vector.shape_cast %53 : vector<1x128x128xbf16> to vector<128x128xbf16>
    %cst_46 = arith.constant dense<0.000000e+00> : vector<8x128xf32>
    %55 = tpu.matmul %52, %54, %cst_46 {dimension_numbers = #tpu.dot_dimension_numbers<[1], [0], [0], [1], [0, 0, 1, 1], [], []>} : vector<8x128xbf16>, vector<128x128xbf16>, vector<8x128xf32> -> vector<8x128xf32>
    %56 = arith.addf %48, %55 : vector<8x128xf32>
    %c1_i32_47 = arith.constant 1 : i32
    %57 = arith.addi %arg1, %c1_i32_47 : i32
    %c1_48 = arith.constant 1 : index
    %58 = arith.index_cast %57 : i32 to index
    %c0_49 = arith.constant 0 : index
    %c0_50 = arith.constant 0 : index
    %59 = vector.load %arg3[%c1_48, %58, %c0_49, %c0_50] : memref<4x9x9x128xbf16, #tpu.memory_space<vmem>>, vector<1x1x8x128xbf16>
    %60 = vector.shape_cast %59 : vector<1x1x8x128xbf16> to vector<8x128xbf16>
    %c7 = arith.constant 7 : index
    %c0_51 = arith.constant 0 : index
    %c0_52 = arith.constant 0 : index
    %61 = vector.load %arg4[%c7, %c0_51, %c0_52] : memref<9x128x128xbf16, #tpu.memory_space<vmem>>, vector<1x128x128xbf16>
    %62 = vector.shape_cast %61 : vector<1x128x128xbf16> to vector<128x128xbf16>
    %cst_53 = arith.constant dense<0.000000e+00> : vector<8x128xf32>
    %63 = tpu.matmul %60, %62, %cst_53 {dimension_numbers = #tpu.dot_dimension_numbers<[1], [0], [0], [1], [0, 0, 1, 1], [], []>} : vector<8x128xbf16>, vector<128x128xbf16>, vector<8x128xf32> -> vector<8x128xf32>
    %64 = arith.addf %56, %63 : vector<8x128xf32>
    %c1_i32_54 = arith.constant 1 : i32
    %65 = arith.addi %arg1, %c1_i32_54 : i32
    %c0_55 = arith.constant 0 : index
    %66 = arith.index_cast %65 : i32 to index
    %c1_56 = arith.constant 1 : index
    %c0_57 = arith.constant 0 : index
    %67 = vector.load %arg3[%c0_55, %66, %c1_56, %c0_57] : memref<4x9x9x128xbf16, #tpu.memory_space<vmem>>, vector<1x1x8x128xbf16>
    %68 = vector.shape_cast %67 : vector<1x1x8x128xbf16> to vector<8x128xbf16>
    %c8 = arith.constant 8 : index
    %c0_58 = arith.constant 0 : index
    %c0_59 = arith.constant 0 : index
    %69 = vector.load %arg4[%c8, %c0_58, %c0_59] : memref<9x128x128xbf16, #tpu.memory_space<vmem>>, vector<1x128x128xbf16>
    %70 = vector.shape_cast %69 : vector<1x128x128xbf16> to vector<128x128xbf16>
    %cst_60 = arith.constant dense<0.000000e+00> : vector<8x128xf32>
    %71 = tpu.matmul %68, %70, %cst_60 {dimension_numbers = #tpu.dot_dimension_numbers<[1], [0], [0], [1], [0, 0, 1, 1], [], []>} : vector<8x128xbf16>, vector<128x128xbf16>, vector<8x128xf32> -> vector<8x128xf32>
    %72 = arith.addf %64, %71 : vector<8x128xf32>
    %c0_61 = arith.constant 0 : index
    %c0_62 = arith.constant 0 : index
    %73 = vector.load %arg5[%c0_61, %c0_62] : memref<1x128xf32, #tpu.memory_space<vmem>>, vector<1x128xf32>
    %74 = vector.broadcast %73 : vector<1x128xf32> to vector<8x128xf32>
    %75 = arith.mulf %72, %74 : vector<8x128xf32>
    %c0_63 = arith.constant 0 : index
    %c0_64 = arith.constant 0 : index
    %76 = vector.load %arg6[%c0_63, %c0_64] : memref<1x128xf32, #tpu.memory_space<vmem>>, vector<1x128xf32>
    %77 = vector.broadcast %76 : vector<1x128xf32> to vector<8x128xf32>
    %78 = arith.addf %75, %77 : vector<8x128xf32>
    %cst_65 = arith.constant 0.000000e+00 : f32
    %79 = vector.broadcast %cst_65 : f32 to vector<8x128xf32>
    %80 = arith.maximumf %78, %79 : vector<8x128xf32>
    %81 = arith.truncf %80 : vector<8x128xf32> to vector<8x128xbf16>
    %c0_66 = arith.constant 0 : index
    %c0_67 = arith.constant 0 : index
    %c0_68 = arith.constant 0 : index
    %c0_69 = arith.constant 0 : index
    %82 = vector.load %arg7[%c0_66, %c0_67, %c0_68, %c0_69] : memref<1x1x8x128xbf16, #tpu.memory_space<vmem>>, vector<1x1x8x128xbf16>
    %83 = vector.shape_cast %82 : vector<1x1x8x128xbf16> to vector<8x128xbf16>
    %84 = vector.shape_cast %81 : vector<8x128xbf16> to vector<1x1x8x128xbf16>
    tpu.vector_store %arg7[%c0_66, %c0_67, %c0_68, %c0_69], %84 {strides = array<i32>} : memref<1x1x8x128xbf16, #tpu.memory_space<vmem>>, vector<1x1x8x128xbf16>,
    return
  }
  func.func @transform_0(%arg0: i32, %arg1: i32, %arg2: i32) -> (i32, i32, i32, i32) {
    %c0_i32 = arith.constant 0 : i32
    %c0_i32_0 = arith.constant 0 : i32
    %c0_i32_1 = arith.constant 0 : i32
    %c0_i32_2 = arith.constant 0 : i32
    return %arg0, %c0_i32, %c0_i32_0, %c0_i32_1 : i32, i32, i32, i32
  }
  func.func @transform_1(%arg0: i32, %arg1: i32, %arg2: i32) -> (i32, i32, i32) {
    %c0_i32 = arith.constant 0 : i32
    %c0_i32_0 = arith.constant 0 : i32
    %c0_i32_1 = arith.constant 0 : i32
    return %c0_i32, %c0_i32_0, %arg2 : i32, i32, i32
  }
  func.func @transform_2(%arg0: i32, %arg1: i32, %arg2: i32) -> (i32, i32) {
    %c0_i32 = arith.constant 0 : i32
    %c0_i32_0 = arith.constant 0 : i32
    return %c0_i32, %arg2 : i32, i32
  }
  func.func @transform_3(%arg0: i32, %arg1: i32, %arg2: i32) -> (i32, i32) {
    %c0_i32 = arith.constant 0 : i32
    %c0_i32_0 = arith.constant 0 : i32
    return %c0_i32, %arg2 : i32, i32
  }
  func.func @transform_4(%arg0: i32, %arg1: i32, %arg2: i32) -> (i32, i32, i32, i32) {
    %c0_i32 = arith.constant 0 : i32
    %c0_i32_0 = arith.constant 0 : i32
    return %arg0, %arg1, %c0_i32, %arg2 : i32, i32, i32, i32
  }
}

module attributes {stable_mosaic.version = 11 : i64} {
  func.func @_matmul_bn_act_kernel(%arg0: i32, %arg1: i32, %arg2: i32, %arg3: memref<128x128xbf16, #tpu.memory_space<vmem>>, %arg4: memref<128x128xbf16, #tpu.memory_space<vmem>>, %arg5: memref<1x128xf32, #tpu.memory_space<vmem>>, %arg6: memref<1x128xf32, #tpu.memory_space<vmem>>, %arg7: memref<128x128xbf16, #tpu.memory_space<vmem>>, %arg8: memref<128x128xf32, #tpu.memory_space<vmem>>) attributes {dimension_semantics = [#tpu.dimension_semantics<parallel>, #tpu.dimension_semantics<parallel>, #tpu.dimension_semantics<arbitrary>], iteration_bounds = array<i64: 1, 1, 1>, scalar_prefetch = 0 : i64, scratch_operands = 1 : i64, tpu.core_type = #tpu.core_type<tc>, window_params = [{transform_indices = @transform_0, window_bounds = array<i64: 128, 128>}, {transform_indices = @transform_1, window_bounds = array<i64: 128, 128>}, {transform_indices = @transform_2, window_bounds = array<i64: 1, 128>}, {transform_indices = @transform_3, window_bounds = array<i64: 1, 128>}, {transform_indices = @transform_4, window_bounds = array<i64: 128, 128>}]} {
    %c0_i32 = arith.constant 0 : i32
    %0 = arith.cmpi eq, %arg2, %c0_i32 : i32
    %1 = arith.extui %0 : i1 to i32
    %c0_i32_0 = arith.constant 0 : i32
    %2 = arith.cmpi ne, %1, %c0_i32_0 : i32
    scf.if %2 {
      %cst_10 = arith.constant 0.000000e+00 : f32
      %12 = vector.broadcast %cst_10 : f32 to vector<128x128xf32>
      %c0_11 = arith.constant 0 : index
      %c0_12 = arith.constant 0 : index
      %13 = vector.load %arg8[%c0_11, %c0_12] : memref<128x128xf32, #tpu.memory_space<vmem>>, vector<128x128xf32>
      tpu.vector_store %arg8[%c0_11, %c0_12], %12 {strides = array<i32>} : memref<128x128xf32, #tpu.memory_space<vmem>>, vector<128x128xf32>,
    } else {
    }
    %c0 = arith.constant 0 : index
    %c0_1 = arith.constant 0 : index
    %3 = vector.load %arg8[%c0, %c0_1] : memref<128x128xf32, #tpu.memory_space<vmem>>, vector<128x128xf32>
    %c0_2 = arith.constant 0 : index
    %c0_3 = arith.constant 0 : index
    %4 = vector.load %arg3[%c0_2, %c0_3] : memref<128x128xbf16, #tpu.memory_space<vmem>>, vector<128x128xbf16>
    %c0_4 = arith.constant 0 : index
    %c0_5 = arith.constant 0 : index
    %5 = vector.load %arg4[%c0_4, %c0_5] : memref<128x128xbf16, #tpu.memory_space<vmem>>, vector<128x128xbf16>
    %cst = arith.constant dense<0.000000e+00> : vector<128x128xf32>
    %6 = tpu.matmul %4, %5, %cst {dimension_numbers = #tpu.dot_dimension_numbers<[1], [0], [0], [1], [0, 0, 1, 1], [], []>} : vector<128x128xbf16>, vector<128x128xbf16>, vector<128x128xf32> -> vector<128x128xf32>
    %7 = arith.addf %3, %6 : vector<128x128xf32>
    %c0_6 = arith.constant 0 : index
    %c0_7 = arith.constant 0 : index
    %8 = vector.load %arg8[%c0_6, %c0_7] : memref<128x128xf32, #tpu.memory_space<vmem>>, vector<128x128xf32>
    tpu.vector_store %arg8[%c0_6, %c0_7], %7 {strides = array<i32>} : memref<128x128xf32, #tpu.memory_space<vmem>>, vector<128x128xf32>,
    %c0_i32_8 = arith.constant 0 : i32
    %9 = arith.cmpi eq, %arg2, %c0_i32_8 : i32
    %10 = arith.extui %9 : i1 to i32
    %c0_i32_9 = arith.constant 0 : i32
    %11 = arith.cmpi ne, %10, %c0_i32_9 : i32
    scf.if %11 {
      %c0_10 = arith.constant 0 : index
      %c0_11 = arith.constant 0 : index
      %12 = vector.load %arg8[%c0_10, %c0_11] : memref<128x128xf32, #tpu.memory_space<vmem>>, vector<128x128xf32>
      %c0_12 = arith.constant 0 : index
      %c0_13 = arith.constant 0 : index
      %13 = vector.load %arg5[%c0_12, %c0_13] : memref<1x128xf32, #tpu.memory_space<vmem>>, vector<1x128xf32>
      %14 = vector.broadcast %13 : vector<1x128xf32> to vector<128x128xf32>
      %15 = arith.mulf %12, %14 : vector<128x128xf32>
      %c0_14 = arith.constant 0 : index
      %c0_15 = arith.constant 0 : index
      %16 = vector.load %arg6[%c0_14, %c0_15] : memref<1x128xf32, #tpu.memory_space<vmem>>, vector<1x128xf32>
      %17 = vector.broadcast %16 : vector<1x128xf32> to vector<128x128xf32>
      %18 = arith.addf %15, %17 : vector<128x128xf32>
      %19 = arith.truncf %18 : vector<128x128xf32> to vector<128x128xbf16>
      %c0_16 = arith.constant 0 : index
      %c0_17 = arith.constant 0 : index
      %20 = vector.load %arg7[%c0_16, %c0_17] : memref<128x128xbf16, #tpu.memory_space<vmem>>, vector<128x128xbf16>
      tpu.vector_store %arg7[%c0_16, %c0_17], %19 {strides = array<i32>} : memref<128x128xbf16, #tpu.memory_space<vmem>>, vector<128x128xbf16>,
    } else {
    }
    return
  }
  func.func @transform_0(%arg0: i32, %arg1: i32, %arg2: i32) -> (i32, i32) {
    %c0_i32 = arith.constant 0 : i32
    return %arg0, %arg2 : i32, i32
  }
  func.func @transform_1(%arg0: i32, %arg1: i32, %arg2: i32) -> (i32, i32) {
    %c0_i32 = arith.constant 0 : i32
    return %arg2, %arg1 : i32, i32
  }
  func.func @transform_2(%arg0: i32, %arg1: i32, %arg2: i32) -> (i32, i32) {
    %c0_i32 = arith.constant 0 : i32
    %c0_i32_0 = arith.constant 0 : i32
    return %c0_i32, %arg1 : i32, i32
  }
  func.func @transform_3(%arg0: i32, %arg1: i32, %arg2: i32) -> (i32, i32) {
    %c0_i32 = arith.constant 0 : i32
    %c0_i32_0 = arith.constant 0 : i32
    return %c0_i32, %arg1 : i32, i32
  }
  func.func @transform_4(%arg0: i32, %arg1: i32, %arg2: i32) -> (i32, i32) {
    %c0_i32 = arith.constant 0 : i32
    return %arg0, %arg1 : i32, i32
  }
}

module attributes {stable_mosaic.version = 11 : i64} {
  func.func @_matmul_bn_act_kernel(%arg0: i32, %arg1: i32, %arg2: i32, %arg3: memref<128x128xbf16, #tpu.memory_space<vmem>>, %arg4: memref<128x128xbf16, #tpu.memory_space<vmem>>, %arg5: memref<1x128xf32, #tpu.memory_space<vmem>>, %arg6: memref<1x128xf32, #tpu.memory_space<vmem>>, %arg7: memref<128x128xbf16, #tpu.memory_space<vmem>>, %arg8: memref<128x128xf32, #tpu.memory_space<vmem>>, %arg9: memref<128x128xf32, #tpu.memory_space<vmem>>) attributes {dimension_semantics = [#tpu.dimension_semantics<parallel>, #tpu.dimension_semantics<parallel>, #tpu.dimension_semantics<arbitrary>], iteration_bounds = array<i64: 1, 1, 1>, scalar_prefetch = 0 : i64, scratch_operands = 1 : i64, tpu.core_type = #tpu.core_type<tc>, window_params = [{transform_indices = @transform_0, window_bounds = array<i64: 128, 128>}, {transform_indices = @transform_1, window_bounds = array<i64: 128, 128>}, {transform_indices = @transform_2, window_bounds = array<i64: 1, 128>}, {transform_indices = @transform_3, window_bounds = array<i64: 1, 128>}, {transform_indices = @transform_4, window_bounds = array<i64: 128, 128>}, {transform_indices = @transform_5, window_bounds = array<i64: 128, 128>}]} {
    %c0_i32 = arith.constant 0 : i32
    %0 = arith.cmpi eq, %arg2, %c0_i32 : i32
    %1 = arith.extui %0 : i1 to i32
    %c0_i32_0 = arith.constant 0 : i32
    %2 = arith.cmpi ne, %1, %c0_i32_0 : i32
    scf.if %2 {
      %cst_10 = arith.constant 0.000000e+00 : f32
      %12 = vector.broadcast %cst_10 : f32 to vector<128x128xf32>
      %c0_11 = arith.constant 0 : index
      %c0_12 = arith.constant 0 : index
      %13 = vector.load %arg9[%c0_11, %c0_12] : memref<128x128xf32, #tpu.memory_space<vmem>>, vector<128x128xf32>
      tpu.vector_store %arg9[%c0_11, %c0_12], %12 {strides = array<i32>} : memref<128x128xf32, #tpu.memory_space<vmem>>, vector<128x128xf32>,
    } else {
    }
    %c0 = arith.constant 0 : index
    %c0_1 = arith.constant 0 : index
    %3 = vector.load %arg9[%c0, %c0_1] : memref<128x128xf32, #tpu.memory_space<vmem>>, vector<128x128xf32>
    %c0_2 = arith.constant 0 : index
    %c0_3 = arith.constant 0 : index
    %4 = vector.load %arg3[%c0_2, %c0_3] : memref<128x128xbf16, #tpu.memory_space<vmem>>, vector<128x128xbf16>
    %c0_4 = arith.constant 0 : index
    %c0_5 = arith.constant 0 : index
    %5 = vector.load %arg4[%c0_4, %c0_5] : memref<128x128xbf16, #tpu.memory_space<vmem>>, vector<128x128xbf16>
    %cst = arith.constant dense<0.000000e+00> : vector<128x128xf32>
    %6 = tpu.matmul %4, %5, %cst {dimension_numbers = #tpu.dot_dimension_numbers<[1], [0], [0], [1], [0, 0, 1, 1], [], []>} : vector<128x128xbf16>, vector<128x128xbf16>, vector<128x128xf32> -> vector<128x128xf32>
    %7 = arith.addf %3, %6 : vector<128x128xf32>
    %c0_6 = arith.constant 0 : index
    %c0_7 = arith.constant 0 : index
    %8 = vector.load %arg9[%c0_6, %c0_7] : memref<128x128xf32, #tpu.memory_space<vmem>>, vector<128x128xf32>
    tpu.vector_store %arg9[%c0_6, %c0_7], %7 {strides = array<i32>} : memref<128x128xf32, #tpu.memory_space<vmem>>, vector<128x128xf32>,
    %c0_i32_8 = arith.constant 0 : i32
    %9 = arith.cmpi eq, %arg2, %c0_i32_8 : i32
    %10 = arith.extui %9 : i1 to i32
    %c0_i32_9 = arith.constant 0 : i32
    %11 = arith.cmpi ne, %10, %c0_i32_9 : i32
    scf.if %11 {
      %c0_10 = arith.constant 0 : index
      %c0_11 = arith.constant 0 : index
      %12 = vector.load %arg9[%c0_10, %c0_11] : memref<128x128xf32, #tpu.memory_space<vmem>>, vector<128x128xf32>
      %c0_12 = arith.constant 0 : index
      %c0_13 = arith.constant 0 : index
      %13 = vector.load %arg5[%c0_12, %c0_13] : memref<1x128xf32, #tpu.memory_space<vmem>>, vector<1x128xf32>
      %14 = vector.broadcast %13 : vector<1x128xf32> to vector<128x128xf32>
      %15 = arith.mulf %12, %14 : vector<128x128xf32>
      %c0_14 = arith.constant 0 : index
      %c0_15 = arith.constant 0 : index
      %16 = vector.load %arg6[%c0_14, %c0_15] : memref<1x128xf32, #tpu.memory_space<vmem>>, vector<1x128xf32>
      %17 = vector.broadcast %16 : vector<1x128xf32> to vector<128x128xf32>
      %18 = arith.addf %15, %17 : vector<128x128xf32>
      %c0_16 = arith.constant 0 : index
      %c0_17 = arith.constant 0 : index
      %19 = vector.load %arg7[%c0_16, %c0_17] : memref<128x128xbf16, #tpu.memory_space<vmem>>, vector<128x128xbf16>
      %20 = arith.extf %19 : vector<128x128xbf16> to vector<128x128xf32>
      %21 = arith.addf %18, %20 : vector<128x128xf32>
      %cst_18 = arith.constant 0.000000e+00 : f32
      %22 = vector.broadcast %cst_18 : f32 to vector<128x128xf32>
      %23 = arith.maximumf %21, %22 : vector<128x128xf32>
      %c0_19 = arith.constant 0 : index
      %c0_20 = arith.constant 0 : index
      %24 = vector.load %arg8[%c0_19, %c0_20] : memref<128x128xf32, #tpu.memory_space<vmem>>, vector<128x128xf32>
      tpu.vector_store %arg8[%c0_19, %c0_20], %23 {strides = array<i32>} : memref<128x128xf32, #tpu.memory_space<vmem>>, vector<128x128xf32>,
    } else {
    }
    return
  }
  func.func @transform_0(%arg0: i32, %arg1: i32, %arg2: i32) -> (i32, i32) {
    %c0_i32 = arith.constant 0 : i32
    return %arg0, %arg2 : i32, i32
  }
  func.func @transform_1(%arg0: i32, %arg1: i32, %arg2: i32) -> (i32, i32) {
    %c0_i32 = arith.constant 0 : i32
    return %arg2, %arg1 : i32, i32
  }
  func.func @transform_2(%arg0: i32, %arg1: i32, %arg2: i32) -> (i32, i32) {
    %c0_i32 = arith.constant 0 : i32
    %c0_i32_0 = arith.constant 0 : i32
    return %c0_i32, %arg1 : i32, i32
  }
  func.func @transform_3(%arg0: i32, %arg1: i32, %arg2: i32) -> (i32, i32) {
    %c0_i32 = arith.constant 0 : i32
    %c0_i32_0 = arith.constant 0 : i32
    return %c0_i32, %arg1 : i32, i32
  }
  func.func @transform_4(%arg0: i32, %arg1: i32, %arg2: i32) -> (i32, i32) {
    %c0_i32 = arith.constant 0 : i32
    return %arg0, %arg1 : i32, i32
  }
  func.func @transform_5(%arg0: i32, %arg1: i32, %arg2: i32) -> (i32, i32) {
    %c0_i32 = arith.constant 0 : i32
    return %arg0, %arg1 : i32, i32
  }
}

</mosaic_0001>

<bundles_post_ra>
// kernel: bottleneck_forward.4
= control target key start
LH: loop header
LB: loop body
LE: loop exit
PB: predicated region body
PF: predicated region fallthrough
CT: control target
= control target key end

     0   :  { %s1961_s1 = inlined_call_operand.vmem [shape: bf16[128,128], index: 1, kind: input, shape index: {}]   ;;  %s1962_s2 = inlined_call_operand.vmem [shape: f32[1,128], index: 2, kind: input, shape index: {}]   ;;  %s1963_s3 = inlined_call_operand.vmem [shape: f32[1,128], index: 3, kind: input, shape index: {}]   ;;  %s1964_s0 = inlined_call_operand.vmem [shape: bf16[512,128], index: 0, kind: input, shape index: {}]   ;;  %s1965_s4 = inlined_call_operand.vmem [shape: bf16[512,128], index: 4, kind: output, shape index: {}]  }
   0x1   :  { %v1364_v0 = vld [vmem:[%s1961_s1 + $0x38] sm:$0xff]  ;;  %v1363_v1 = vld [vmem:[%s1961_s1 + $0x30] sm:$0xff]  ;;  %v1362_v2 = vld [vmem:[%s1961_s1 + $0x28] sm:$0xff] }
   0x2   :  { %469 = vmatpush.bf16.msra.mxu0 %v1364_v0  ;;  %1556 = vmatpush.bf16.msra.mxu1 %v1364_v0  ;;  %v1361_v3 = vld [vmem:[%s1961_s1 + $0x20] sm:$0xff]  ;;  %v1360_v4 = vld [vmem:[%s1961_s1 + $0x18] sm:$0xff]  ;;  %v1359_v5 = vld [vmem:[%s1961_s1 + $0x10] sm:$0xff] }
   0x3   :  { %1557 = vmatpush.bf16.msra.mxu2 %v1364_v0  ;;  %1558 = vmatpush.bf16.msra.mxu3 %v1364_v0  ;;  %v1358_v6 = vld [vmem:[%s1961_s1 + $0x8] sm:$0xff]  ;;  %v1357_v7 = vld [vmem:[%s1961_s1] sm:$0xff]  ;;  %v1327_v16 = vld [vmem:[%s1964_s0 + $0x10] sm:$0xff] }
   0x4   :  { %v1325_v8 = vld [vmem:[%s1964_s0] sm:$0xff]  ;;  %v1326_v12 = vld [vmem:[%s1964_s0 + $0x8] sm:$0xff]  ;;  %v1335_v17 = vld [vmem:[%s1964_s0 + $0x50] sm:$0xff] }
   0x5   :  { %v1333_v9 = vld [vmem:[%s1964_s0 + $0x40] sm:$0xff]  ;;  %v1334_v13 = vld [vmem:[%s1964_s0 + $0x48] sm:$0xff]  ;;  %v1343_v18 = vld [vmem:[%s1964_s0 + $0x90] sm:$0xff] }
   0x6   :  { %470 = vmatpush.bf16.msra.mxu0 %v1363_v1  ;;  %1559 = vmatpush.bf16.msra.mxu1 %v1363_v1  ;;  %v1341_v10 = vld [vmem:[%s1964_s0 + $0x80] sm:$0xff]  ;;  %v1342_v14 = vld [vmem:[%s1964_s0 + $0x88] sm:$0xff]  ;;  %v1351_v19 = vld [vmem:[%s1964_s0 + $0xd0] sm:$0xff] }
   0x7   :  { %1560 = vmatpush.bf16.msra.mxu2 %v1363_v1  ;;  %1561 = vmatpush.bf16.msra.mxu3 %v1363_v1  ;;  %v1349_v11 = vld [vmem:[%s1964_s0 + $0xc0] sm:$0xff]  ;;  %v1350_v15 = vld [vmem:[%s1964_s0 + $0xc8] sm:$0xff]  ;;  %v1328_v20 = vld [vmem:[%s1964_s0 + $0x18] sm:$0xff] }
   0x8   :  { %v1336_v21 = vld [vmem:[%s1964_s0 + $0x58] sm:$0xff]  ;;  %v1329_v24 = vld [vmem:[%s1964_s0 + $0x20] sm:$0xff]  ;;  %v1330_v28 = vld [vmem:[%s1964_s0 + $0x28] sm:$0xff] }
   0x9   :  { %v1344_v22 = vld [vmem:[%s1964_s0 + $0x98] sm:$0xff]  ;;  %v1337_v25 = vld [vmem:[%s1964_s0 + $0x60] sm:$0xff]  ;;  %v1338_v29 = vld [vmem:[%s1964_s0 + $0x68] sm:$0xff] }
   0xa   :  { %471 = vmatpush.bf16.msra.mxu0 %v1362_v2  ;;  %1562 = vmatpush.bf16.msra.mxu1 %v1362_v2  ;;  %v1352_v23 = vld [vmem:[%s1964_s0 + $0xd8] sm:$0xff]  ;;  %v1345_v26 = vld [vmem:[%s1964_s0 + $0xa0] sm:$0xff]  ;;  %v1346_v30 = vld [vmem:[%s1964_s0 + $0xa8] sm:$0xff] }
   0xb   :  { %1563 = vmatpush.bf16.msra.mxu2 %v1362_v2  ;;  %1564 = vmatpush.bf16.msra.mxu3 %v1362_v2  ;;  %v1353_v27 = vld [vmem:[%s1964_s0 + $0xe0] sm:$0xff]  ;;  %v1354_v31 = vld [vmem:[%s1964_s0 + $0xe8] sm:$0xff]  ;;  %v1331_v32 = vld [vmem:[%s1964_s0 + $0x30] sm:$0xff] }
   0xc   :  { %v1339_v33 = vld [vmem:[%s1964_s0 + $0x70] sm:$0xff]  ;;  %v1332_v36 = vld [vmem:[%s1964_s0 + $0x38] sm:$0xff]  ;;  %v1730_v42 = vld [vmem:[%s1962_s2] ss:$0 sm:$0xff] }
   0xd   :  { %v1347_v34 = vld [vmem:[%s1964_s0 + $0xb0] sm:$0xff]  ;;  %v1340_v37 = vld [vmem:[%s1964_s0 + $0x78] sm:$0xff]  ;;  %v1736_v44 = vld [vmem:[%s1963_s3] ss:$0 sm:$0xff] }
   0xe   :  { %472 = vmatpush.bf16.msra.mxu0 %v1361_v3  ;;  %1565 = vmatpush.bf16.msra.mxu1 %v1361_v3  ;;  %v1355_v35 = vld [vmem:[%s1964_s0 + $0xf0] sm:$0xff]  ;;  %v1348_v38 = vld [vmem:[%s1964_s0 + $0xb8] sm:$0xff] }
   0xf   :  { %1566 = vmatpush.bf16.msra.mxu2 %v1361_v3  ;;  %1567 = vmatpush.bf16.msra.mxu3 %v1361_v3  ;;  %v1356_v39 = vld [vmem:[%s1964_s0 + $0xf8] sm:$0xff] }
  0x12   :  { %473 = vmatpush.bf16.msra.mxu0 %v1360_v4  ;;  %1568 = vmatpush.bf16.msra.mxu1 %v1360_v4 }
  0x13   :  { %1569 = vmatpush.bf16.msra.mxu2 %v1360_v4  ;;  %1570 = vmatpush.bf16.msra.mxu3 %v1360_v4 }
  0x16   :  { %474 = vmatpush.bf16.msra.mxu0 %v1359_v5  ;;  %1571 = vmatpush.bf16.msra.mxu1 %v1359_v5 }
  0x17   :  { %1572 = vmatpush.bf16.msra.mxu2 %v1359_v5  ;;  %1573 = vmatpush.bf16.msra.mxu3 %v1359_v5 }
  0x1a   :  { %475 = vmatpush.bf16.msra.mxu0 %v1358_v6  ;;  %1574 = vmatpush.bf16.msra.mxu1 %v1358_v6 }
  0x1b   :  { %1575 = vmatpush.bf16.msra.mxu2 %v1358_v6  ;;  %1576 = vmatpush.bf16.msra.mxu3 %v1358_v6 }
  0x1e   :  { %476 = vmatpush.bf16.msra.mxu0 %v1357_v7  ;;  %1577 = vmatpush.bf16.msra.mxu1 %v1357_v7 }
  0x1f   :  { %1578 = vmatpush.bf16.msra.mxu2 %v1357_v7  ;;  %1579 = vmatpush.bf16.msra.mxu3 %v1357_v7 }
  0x21   :  { %477 = vmatmul.bf16.vlgmr.msra.gmra.mxu0 %v1325_v8  ;;  %517 = vmatmul.bf16.vlgmr.msra.gmra.mxu1 %v1333_v9 }
  0x22   :  { %557 = vmatmul.bf16.vlgmr.msra.gmra.mxu2 %v1341_v10  ;;  %597 = vmatmul.bf16.vlgmr.msra.gmra.mxu3 %v1349_v11 }
  0x31   :  { %482 = vmatmul.bf16.gmra.mxu0 %v1326_v12  ;;  %522 = vmatmul.bf16.gmra.mxu1 %v1334_v13 }
  0x32   :  { %562 = vmatmul.bf16.gmra.mxu2 %v1342_v14  ;;  %602 = vmatmul.bf16.gmra.mxu3 %v1350_v15 }
  0x41   :  { %487 = vmatmul.bf16.gmra.mxu0 %v1327_v16  ;;  %527 = vmatmul.bf16.gmra.mxu1 %v1335_v17 }
  0x42   :  { %567 = vmatmul.bf16.gmra.mxu2 %v1343_v18  ;;  %607 = vmatmul.bf16.gmra.mxu3 %v1351_v19 }
  0x51   :  { %492 = vmatmul.bf16.gmra.mxu0 %v1328_v20  ;;  %532 = vmatmul.bf16.gmra.mxu1 %v1336_v21 }
  0x52   :  { %572 = vmatmul.bf16.gmra.mxu2 %v1344_v22  ;;  %612 = vmatmul.bf16.gmra.mxu3 %v1352_v23 }
  0x61   :  { %497 = vmatmul.bf16.gmra.mxu0 %v1329_v24  ;;  %537 = vmatmul.bf16.gmra.mxu1 %v1337_v25 }
  0x62   :  { %577 = vmatmul.bf16.gmra.mxu2 %v1345_v26  ;;  %617 = vmatmul.bf16.gmra.mxu3 %v1353_v27 }
  0x71   :  { %502 = vmatmul.bf16.gmra.mxu0 %v1330_v28  ;;  %542 = vmatmul.bf16.gmra.mxu1 %v1338_v29 }
  0x72   :  { %582 = vmatmul.bf16.gmra.mxu2 %v1346_v30  ;;  %622 = vmatmul.bf16.gmra.mxu3 %v1354_v31 }
  0x81   :  { %507 = vmatmul.bf16.gmra.mxu0 %v1331_v32  ;;  %547 = vmatmul.bf16.gmra.mxu1 %v1339_v33 }
  0x82   :  { %587 = vmatmul.bf16.gmra.mxu2 %v1347_v34  ;;  %627 = vmatmul.bf16.gmra.mxu3 %v1355_v35 }
  0x91   :  { %512 = vmatmul.bf16.gmra.mxu0 %v1332_v36  ;;  %552 = vmatmul.bf16.gmra.mxu1 %v1340_v37 }
  0x92   :  { %592 = vmatmul.bf16.gmra.mxu2 %v1348_v38  ;;  %632 = vmatmul.bf16.gmra.mxu3 %v1356_v39 }
  0x9e   :  { %v478_v40 = vpop.f32.mrf.mxu0  ;;  %v518_v41 = vpop.f32.mrf.mxu1 }
  0x9f   :  { %v837_v43 = vmul.f32 %v1730_v42, %v478_v40  ;;  %v853_v45 = vmul.f32 %v1730_v42, %v518_v41 }
  0xa1   :  { %v905_v50 = vadd.f32 %v1736_v44, %v837_v43  ;;  %v921_v51 = vadd.f32 %v1736_v44, %v853_v45 }
  0xa3   :  { %v969_v58 = vmax.f32 %v905_v50, 0.0  ;;  %v985_v59 = vmax.f32 %v921_v51, 0.0 }
  0xa5   :  { %v558_v46 = vpop.f32.mrf.mxu2  ;;  %v598_v47 = vpop.f32.mrf.mxu3 }
  0xa6   :  { %v480_v48 = vpop.f32.mrf.mxu0  ;;  %v520_v49 = vpop.f32.mrf.mxu1  ;;  %v869_v56 = vmul.f32 %v1730_v42, %v558_v46  ;;  %v885_v57 = vmul.f32 %v1730_v42, %v598_v47 }
  0xa7   :  { %v838_v52 = vmul.f32 %v1730_v42, %v480_v48  ;;  %v854_v53 = vmul.f32 %v1730_v42, %v520_v49 }
  0xa8   :  { %v937_v2 = vadd.f32 %v1736_v44, %v869_v56  ;;  %v953_v3 = vadd.f32 %v1736_v44, %v885_v57 }
  0xa9   :  { %v906_v54 = vadd.f32 %v1736_v44, %v838_v52  ;;  %v922_v55 = vadd.f32 %v1736_v44, %v854_v53 }
  0xaa   :  { %v1001_v10 = vmax.f32 %v937_v2, 0.0  ;;  %v1017_v11 = vmax.f32 %v953_v3, 0.0 }
  0xab   :  { %v970_v60 = vmax.f32 %v906_v54, 0.0  ;;  %v986_v61 = vmax.f32 %v922_v55, 0.0 }
  0xad   :  { %v1368_v62 = vpack.c.bf16 %v970_v60, %v969_v58  ;;  %v1408_v63 = vpack.c.bf16 %v986_v61, %v985_v59  ;;  %v560_v0 = vpop.f32.mrf.mxu2  ;;  %v600_v1 = vpop.f32.mrf.mxu3 }
  0xae   :  { %v870_v4 = vmul.f32 %v1730_v42, %v560_v0  ;;  %v886_v5 = vmul.f32 %v1730_v42, %v600_v1  ;;  %v483_v6 = vpop.f32.mrf.mxu0  ;;  %v523_v7 = vpop.f32.mrf.mxu1 }
  0xaf   :  { %1369 = vst [vmem:[%s1965_s4] sm:$0xff] %v1368_v62   ;;  %v839_v14 = vmul.f32 %v1730_v42, %v483_v6  ;;  %v855_v15 = vmul.f32 %v1730_v42, %v523_v7 }
  0xb0   :  { %1532 = vst [vmem:[%s1965_s4 + $0x40] sm:$0xff] %v1408_v63   ;;  %v938_v8 = vadd.f32 %v1736_v44, %v870_v4  ;;  %v954_v9 = vadd.f32 %v1736_v44, %v886_v5 }
  0xb1   :  { %v907_v22 = vadd.f32 %v1736_v44, %v839_v14  ;;  %v923_v23 = vadd.f32 %v1736_v44, %v855_v15 }
  0xb2   :  { %v1002_v12 = vmax.f32 %v938_v8, 0.0  ;;  %v1018_v13 = vmax.f32 %v954_v9, 0.0 }
  0xb3   :  { %v971_v30 = vmax.f32 %v907_v22, 0.0  ;;  %v987_v31 = vmax.f32 %v923_v23, 0.0 }
  0xb4   :  { %v1448_v16 = vpack.c.bf16 %v1002_v12, %v1001_v10  ;;  %v1488_v17 = vpack.c.bf16 %v1018_v13, %v1017_v11 }
  0xb5   :  { %v563_v18 = vpop.f32.mrf.mxu2  ;;  %v603_v19 = vpop.f32.mrf.mxu3 }
  0xb6   :  { %1540 = vst [vmem:[%s1965_s4 + $0x80] sm:$0xff] %v1448_v16   ;;  %v485_v20 = vpop.f32.mrf.mxu0  ;;  %v525_v21 = vpop.f32.mrf.mxu1  ;;  %v871_v28 = vmul.f32 %v1730_v42, %v563_v18  ;;  %v887_v29 = vmul.f32 %v1730_v42, %v603_v19 }
  0xb7   :  { %1548 = vst [vmem:[%s1965_s4 + $0xc0] sm:$0xff] %v1488_v17   ;;  %v840_v24 = vmul.f32 %v1730_v42, %v485_v20  ;;  %v856_v25 = vmul.f32 %v1730_v42, %v525_v21 }
  0xb8   :  { %v939_v38 = vadd.f32 %v1736_v44, %v871_v28  ;;  %v955_v39 = vadd.f32 %v1736_v44, %v887_v29 }
  0xb9   :  { %v908_v26 = vadd.f32 %v1736_v44, %v840_v24  ;;  %v924_v27 = vadd.f32 %v1736_v44, %v856_v25 }
  0xba   :  { %v1003_v48 = vmax.f32 %v939_v38, 0.0  ;;  %v1019_v49 = vmax.f32 %v955_v39, 0.0 }
  0xbb   :  { %v972_v32 = vmax.f32 %v908_v26, 0.0  ;;  %v988_v33 = vmax.f32 %v924_v27, 0.0 }
  0xbd   :  { %v1373_v34 = vpack.c.bf16 %v972_v32, %v971_v30  ;;  %v1413_v35 = vpack.c.bf16 %v988_v33, %v987_v31  ;;  %v565_v36 = vpop.f32.mrf.mxu2  ;;  %v605_v37 = vpop.f32.mrf.mxu3 }
  0xbe   :  { %v872_v40 = vmul.f32 %v1730_v42, %v565_v36  ;;  %v888_v41 = vmul.f32 %v1730_v42, %v605_v37  ;;  %v488_v43 = vpop.f32.mrf.mxu0  ;;  %v528_v45 = vpop.f32.mrf.mxu1 }
  0xbf   :  { %1525 = vst [vmem:[%s1965_s4 + $0x8] sm:$0xff] %v1373_v34   ;;  %v841_v52 = vmul.f32 %v1730_v42, %v488_v43  ;;  %v857_v53 = vmul.f32 %v1730_v42, %v528_v45 }
  0xc0   :  { %1533 = vst [vmem:[%s1965_s4 + $0x48] sm:$0xff] %v1413_v35   ;;  %v940_v46 = vadd.f32 %v1736_v44, %v872_v40  ;;  %v956_v47 = vadd.f32 %v1736_v44, %v888_v41 }
  0xc1   :  { %v909_v60 = vadd.f32 %v1736_v44, %v841_v52  ;;  %v925_v61 = vadd.f32 %v1736_v44, %v857_v53 }
  0xc2   :  { %v1004_v50 = vmax.f32 %v940_v46, 0.0  ;;  %v1020_v51 = vmax.f32 %v956_v47, 0.0 }
  0xc3   :  { %v973_v4 = vmax.f32 %v909_v60, 0.0  ;;  %v989_v5 = vmax.f32 %v925_v61, 0.0 }
  0xc4   :  { %v1453_v54 = vpack.c.bf16 %v1004_v50, %v1003_v48  ;;  %v1493_v55 = vpack.c.bf16 %v1020_v51, %v1019_v49 }
  0xc5   :  { %v568_v56 = vpop.f32.mrf.mxu2  ;;  %v608_v57 = vpop.f32.mrf.mxu3 }
  0xc6   :  { %1541 = vst [vmem:[%s1965_s4 + $0x88] sm:$0xff] %v1453_v54   ;;  %v490_v58 = vpop.f32.mrf.mxu0  ;;  %v530_v59 = vpop.f32.mrf.mxu1  ;;  %v873_v2 = vmul.f32 %v1730_v42, %v568_v56  ;;  %v889_v3 = vmul.f32 %v1730_v42, %v608_v57 }
  0xc7   :  { %1549 = vst [vmem:[%s1965_s4 + $0xc8] sm:$0xff] %v1493_v55   ;;  %v842_v62 = vmul.f32 %v1730_v42, %v490_v58  ;;  %v858_v63 = vmul.f32 %v1730_v42, %v530_v59 }
  0xc8   :  { %v941_v12 = vadd.f32 %v1736_v44, %v873_v2  ;;  %v957_v13 = vadd.f32 %v1736_v44, %v889_v3 }
  0xc9   :  { %v910_v0 = vadd.f32 %v1736_v44, %v842_v62  ;;  %v926_v1 = vadd.f32 %v1736_v44, %v858_v63 }
  0xca   :  { %v1005_v20 = vmax.f32 %v941_v12, 0.0  ;;  %v1021_v21 = vmax.f32 %v957_v13, 0.0 }
  0xcb   :  { %v974_v6 = vmax.f32 %v910_v0, 0.0  ;;  %v990_v7 = vmax.f32 %v926_v1, 0.0 }
  0xcd   :  { %v1378_v8 = vpack.c.bf16 %v974_v6, %v973_v4  ;;  %v1418_v9 = vpack.c.bf16 %v990_v7, %v989_v5  ;;  %v570_v10 = vpop.f32.mrf.mxu2  ;;  %v610_v11 = vpop.f32.mrf.mxu3 }
  0xce   :  { %v874_v14 = vmul.f32 %v1730_v42, %v570_v10  ;;  %v890_v15 = vmul.f32 %v1730_v42, %v610_v11  ;;  %v493_v16 = vpop.f32.mrf.mxu0  ;;  %v533_v17 = vpop.f32.mrf.mxu1 }
  0xcf   :  { %1526 = vst [vmem:[%s1965_s4 + $0x10] sm:$0xff] %v1378_v8   ;;  %v843_v24 = vmul.f32 %v1730_v42, %v493_v16  ;;  %v859_v25 = vmul.f32 %v1730_v42, %v533_v17 }
  0xd0   :  { %1534 = vst [vmem:[%s1965_s4 + $0x50] sm:$0xff] %v1418_v9   ;;  %v942_v18 = vadd.f32 %v1736_v44, %v874_v14  ;;  %v958_v19 = vadd.f32 %v1736_v44, %v890_v15 }
  0xd1   :  { %v911_v32 = vadd.f32 %v1736_v44, %v843_v24  ;;  %v927_v33 = vadd.f32 %v1736_v44, %v859_v25 }
  0xd2   :  { %v1006_v22 = vmax.f32 %v942_v18, 0.0  ;;  %v1022_v23 = vmax.f32 %v958_v19, 0.0 }
  0xd3   :  { %v975_v40 = vmax.f32 %v911_v32, 0.0  ;;  %v991_v41 = vmax.f32 %v927_v33, 0.0 }
  0xd4   :  { %v1458_v26 = vpack.c.bf16 %v1006_v22, %v1005_v20  ;;  %v1498_v27 = vpack.c.bf16 %v1022_v23, %v1021_v21 }
  0xd5   :  { %v573_v28 = vpop.f32.mrf.mxu2  ;;  %v613_v29 = vpop.f32.mrf.mxu3 }
  0xd6   :  { %1542 = vst [vmem:[%s1965_s4 + $0x90] sm:$0xff] %v1458_v26   ;;  %v495_v30 = vpop.f32.mrf.mxu0  ;;  %v535_v31 = vpop.f32.mrf.mxu1  ;;  %v875_v38 = vmul.f32 %v1730_v42, %v573_v28  ;;  %v891_v39 = vmul.f32 %v1730_v42, %v613_v29 }
  0xd7   :  { %1550 = vst [vmem:[%s1965_s4 + $0xd0] sm:$0xff] %v1498_v27   ;;  %v844_v34 = vmul.f32 %v1730_v42, %v495_v30  ;;  %v860_v35 = vmul.f32 %v1730_v42, %v535_v31 }
  0xd8   :  { %v943_v50 = vadd.f32 %v1736_v44, %v875_v38  ;;  %v959_v51 = vadd.f32 %v1736_v44, %v891_v39 }
  0xd9   :  { %v912_v36 = vadd.f32 %v1736_v44, %v844_v34  ;;  %v928_v37 = vadd.f32 %v1736_v44, %v860_v35 }
  0xda   :  { %v1007_v58 = vmax.f32 %v943_v50, 0.0  ;;  %v1023_v59 = vmax.f32 %v959_v51, 0.0 }
  0xdb   :  { %v976_v43 = vmax.f32 %v912_v36, 0.0  ;;  %v992_v45 = vmax.f32 %v928_v37, 0.0 }
  0xdd   :  { %v1383_v46 = vpack.c.bf16 %v976_v43, %v975_v40  ;;  %v1423_v47 = vpack.c.bf16 %v992_v45, %v991_v41  ;;  %v575_v48 = vpop.f32.mrf.mxu2  ;;  %v615_v49 = vpop.f32.mrf.mxu3 }
  0xde   :  { %v876_v52 = vmul.f32 %v1730_v42, %v575_v48  ;;  %v892_v53 = vmul.f32 %v1730_v42, %v615_v49  ;;  %v498_v54 = vpop.f32.mrf.mxu0  ;;  %v538_v55 = vpop.f32.mrf.mxu1 }
  0xdf   :  { %1527 = vst [vmem:[%s1965_s4 + $0x18] sm:$0xff] %v1383_v46   ;;  %v845_v62 = vmul.f32 %v1730_v42, %v498_v54  ;;  %v861_v63 = vmul.f32 %v1730_v42, %v538_v55 }
  0xe0   :  { %1535 = vst [vmem:[%s1965_s4 + $0x58] sm:$0xff] %v1423_v47   ;;  %v944_v56 = vadd.f32 %v1736_v44, %v876_v52  ;;  %v960_v57 = vadd.f32 %v1736_v44, %v892_v53 }
  0xe1   :  { %v913_v6 = vadd.f32 %v1736_v44, %v845_v62  ;;  %v929_v7 = vadd.f32 %v1736_v44, %v861_v63 }
  0xe2   :  { %v1008_v60 = vmax.f32 %v944_v56, 0.0  ;;  %v1024_v61 = vmax.f32 %v960_v57, 0.0 }
  0xe3   :  { %v977_v14 = vmax.f32 %v913_v6, 0.0  ;;  %v993_v15 = vmax.f32 %v929_v7, 0.0 }
  0xe4   :  { %v1463_v0 = vpack.c.bf16 %v1008_v60, %v1007_v58  ;;  %v1503_v1 = vpack.c.bf16 %v1024_v61, %v1023_v59 }
  0xe5   :  { %v578_v2 = vpop.f32.mrf.mxu2  ;;  %v618_v3 = vpop.f32.mrf.mxu3 }
  0xe6   :  { %1543 = vst [vmem:[%s1965_s4 + $0x98] sm:$0xff] %v1463_v0   ;;  %v500_v4 = vpop.f32.mrf.mxu0  ;;  %v540_v5 = vpop.f32.mrf.mxu1  ;;  %v877_v12 = vmul.f32 %v1730_v42, %v578_v2  ;;  %v893_v13 = vmul.f32 %v1730_v42, %v618_v3 }
  0xe7   :  { %1551 = vst [vmem:[%s1965_s4 + $0xd8] sm:$0xff] %v1503_v1   ;;  %v846_v8 = vmul.f32 %v1730_v42, %v500_v4  ;;  %v862_v9 = vmul.f32 %v1730_v42, %v540_v5 }
  0xe8   :  { %v945_v22 = vadd.f32 %v1736_v44, %v877_v12  ;;  %v961_v23 = vadd.f32 %v1736_v44, %v893_v13 }
  0xe9   :  { %v914_v10 = vadd.f32 %v1736_v44, %v846_v8  ;;  %v930_v11 = vadd.f32 %v1736_v44, %v862_v9 }
  0xea   :  { %v1009_v30 = vmax.f32 %v945_v22, 0.0  ;;  %v1025_v31 = vmax.f32 %v961_v23, 0.0 }
  0xeb   :  { %v978_v16 = vmax.f32 %v914_v10, 0.0  ;;  %v994_v17 = vmax.f32 %v930_v11, 0.0 }
  0xed   :  { %v1388_v18 = vpack.c.bf16 %v978_v16, %v977_v14  ;;  %v1428_v19 = vpack.c.bf16 %v994_v17, %v993_v15  ;;  %v580_v20 = vpop.f32.mrf.mxu2  ;;  %v620_v21 = vpop.f32.mrf.mxu3 }
  0xee   :  { %v878_v24 = vmul.f32 %v1730_v42, %v580_v20  ;;  %v894_v25 = vmul.f32 %v1730_v42, %v620_v21  ;;  %v503_v26 = vpop.f32.mrf.mxu0  ;;  %v543_v27 = vpop.f32.mrf.mxu1 }
  0xef   :  { %1528 = vst [vmem:[%s1965_s4 + $0x20] sm:$0xff] %v1388_v18   ;;  %v847_v34 = vmul.f32 %v1730_v42, %v503_v26  ;;  %v863_v35 = vmul.f32 %v1730_v42, %v543_v27 }
  0xf0   :  { %1536 = vst [vmem:[%s1965_s4 + $0x60] sm:$0xff] %v1428_v19   ;;  %v946_v28 = vadd.f32 %v1736_v44, %v878_v24  ;;  %v962_v29 = vadd.f32 %v1736_v44, %v894_v25 }
  0xf1   :  { %v915_v43 = vadd.f32 %v1736_v44, %v847_v34  ;;  %v931_v45 = vadd.f32 %v1736_v44, %v863_v35 }
  0xf2   :  { %v1010_v32 = vmax.f32 %v946_v28, 0.0  ;;  %v1026_v33 = vmax.f32 %v962_v29, 0.0 }
  0xf3   :  { %v979_v52 = vmax.f32 %v915_v43, 0.0  ;;  %v995_v53 = vmax.f32 %v931_v45, 0.0 }
  0xf4   :  { %v1468_v36 = vpack.c.bf16 %v1010_v32, %v1009_v30  ;;  %v1508_v37 = vpack.c.bf16 %v1026_v33, %v1025_v31 }
  0xf5   :  { %v583_v38 = vpop.f32.mrf.mxu2  ;;  %v623_v39 = vpop.f32.mrf.mxu3 }
  0xf6   :  { %1544 = vst [vmem:[%s1965_s4 + $0xa0] sm:$0xff] %v1468_v36   ;;  %v505_v40 = vpop.f32.mrf.mxu0  ;;  %v545_v41 = vpop.f32.mrf.mxu1  ;;  %v879_v50 = vmul.f32 %v1730_v42, %v583_v38  ;;  %v895_v51 = vmul.f32 %v1730_v42, %v623_v39 }
  0xf7   :  { %1552 = vst [vmem:[%s1965_s4 + $0xe0] sm:$0xff] %v1508_v37   ;;  %v848_v46 = vmul.f32 %v1730_v42, %v505_v40  ;;  %v864_v47 = vmul.f32 %v1730_v42, %v545_v41 }
  0xf8   :  { %v947_v60 = vadd.f32 %v1736_v44, %v879_v50  ;;  %v963_v61 = vadd.f32 %v1736_v44, %v895_v51 }
  0xf9   :  { %v916_v48 = vadd.f32 %v1736_v44, %v848_v46  ;;  %v932_v49 = vadd.f32 %v1736_v44, %v864_v47 }
  0xfa   :  { %v1011_v4 = vmax.f32 %v947_v60, 0.0  ;;  %v1027_v5 = vmax.f32 %v963_v61, 0.0 }
  0xfb   :  { %v980_v54 = vmax.f32 %v916_v48, 0.0  ;;  %v996_v55 = vmax.f32 %v932_v49, 0.0 }
  0xfd   :  { %v1393_v56 = vpack.c.bf16 %v980_v54, %v979_v52  ;;  %v1433_v57 = vpack.c.bf16 %v996_v55, %v995_v53  ;;  %v585_v58 = vpop.f32.mrf.mxu2  ;;  %v625_v59 = vpop.f32.mrf.mxu3 }
  0xfe   :  { %v880_v62 = vmul.f32 %v1730_v42, %v585_v58  ;;  %v896_v63 = vmul.f32 %v1730_v42, %v625_v59  ;;  %v508_v0 = vpop.f32.mrf.mxu0  ;;  %v548_v1 = vpop.f32.mrf.mxu1 }
  0xff   :  { %1529 = vst [vmem:[%s1965_s4 + $0x28] sm:$0xff] %v1393_v56   ;;  %v849_v8 = vmul.f32 %v1730_v42, %v508_v0  ;;  %v865_v9 = vmul.f32 %v1730_v42, %v548_v1 }
 0x100   :  { %1537 = vst [vmem:[%s1965_s4 + $0x68] sm:$0xff] %v1433_v57   ;;  %v948_v2 = vadd.f32 %v1736_v44, %v880_v62  ;;  %v964_v3 = vadd.f32 %v1736_v44, %v896_v63 }
 0x101   :  { %v917_v16 = vadd.f32 %v1736_v44, %v849_v8  ;;  %v933_v17 = vadd.f32 %v1736_v44, %v865_v9 }
 0x102   :  { %v1012_v6 = vmax.f32 %v948_v2, 0.0  ;;  %v1028_v7 = vmax.f32 %v964_v3, 0.0 }
 0x103   :  { %v981_v24 = vmax.f32 %v917_v16, 0.0  ;;  %v997_v25 = vmax.f32 %v933_v17, 0.0 }
 0x104   :  { %v1473_v10 = vpack.c.bf16 %v1012_v6, %v1011_v4  ;;  %v1513_v11 = vpack.c.bf16 %v1028_v7, %v1027_v5 }
 0x105   :  { %v588_v12 = vpop.f32.mrf.mxu2  ;;  %v628_v13 = vpop.f32.mrf.mxu3 }
 0x106   :  { %1545 = vst [vmem:[%s1965_s4 + $0xa8] sm:$0xff] %v1473_v10   ;;  %v510_v14 = vpop.f32.mrf.mxu0  ;;  %v550_v15 = vpop.f32.mrf.mxu1  ;;  %v881_v22 = vmul.f32 %v1730_v42, %v588_v12  ;;  %v897_v23 = vmul.f32 %v1730_v42, %v628_v13 }
 0x107   :  { %1553 = vst [vmem:[%s1965_s4 + $0xe8] sm:$0xff] %v1513_v11   ;;  %v850_v18 = vmul.f32 %v1730_v42, %v510_v14  ;;  %v866_v19 = vmul.f32 %v1730_v42, %v550_v15 }
 0x108   :  { %v949_v32 = vadd.f32 %v1736_v44, %v881_v22  ;;  %v965_v33 = vadd.f32 %v1736_v44, %v897_v23 }
 0x109   :  { %v918_v20 = vadd.f32 %v1736_v44, %v850_v18  ;;  %v934_v21 = vadd.f32 %v1736_v44, %v866_v19 }
 0x10a   :  { %v1013_v40 = vmax.f32 %v949_v32, 0.0  ;;  %v1029_v41 = vmax.f32 %v965_v33, 0.0 }
 0x10b   :  { %v982_v26 = vmax.f32 %v918_v20, 0.0  ;;  %v998_v27 = vmax.f32 %v934_v21, 0.0 }
 0x10d   :  { %v1398_v28 = vpack.c.bf16 %v982_v26, %v981_v24  ;;  %v1438_v29 = vpack.c.bf16 %v998_v27, %v997_v25  ;;  %v590_v30 = vpop.f32.mrf.mxu2  ;;  %v630_v31 = vpop.f32.mrf.mxu3 }
 0x10e   :  { %v882_v34 = vmul.f32 %v1730_v42, %v590_v30  ;;  %v898_v35 = vmul.f32 %v1730_v42, %v630_v31  ;;  %v513_v36 = vpop.f32.mrf.mxu0  ;;  %v553_v37 = vpop.f32.mrf.mxu1 }
 0x10f   :  { %1530 = vst [vmem:[%s1965_s4 + $0x30] sm:$0xff] %v1398_v28   ;;  %v851_v46 = vmul.f32 %v1730_v42, %v513_v36  ;;  %v867_v47 = vmul.f32 %v1730_v42, %v553_v37 }
 0x110   :  { %1538 = vst [vmem:[%s1965_s4 + $0x70] sm:$0xff] %v1438_v29   ;;  %v950_v38 = vadd.f32 %v1736_v44, %v882_v34  ;;  %v966_v39 = vadd.f32 %v1736_v44, %v898_v35 }
 0x111   :  { %v919_v54 = vadd.f32 %v1736_v44, %v851_v46  ;;  %v935_v55 = vadd.f32 %v1736_v44, %v867_v47 }
 0x112   :  { %v1014_v43 = vmax.f32 %v950_v38, 0.0  ;;  %v1030_v45 = vmax.f32 %v966_v39, 0.0 }
 0x113   :  { %v983_v62 = vmax.f32 %v919_v54, 0.0  ;;  %v999_v63 = vmax.f32 %v935_v55, 0.0 }
 0x114   :  { %v1478_v48 = vpack.c.bf16 %v1014_v43, %v1013_v40  ;;  %v1518_v49 = vpack.c.bf16 %v1030_v45, %v1029_v41 }
 0x115   :  { %v593_v50 = vpop.f32.mrf.mxu2  ;;  %v633_v51 = vpop.f32.mrf.mxu3 }
 0x116   :  { %1546 = vst [vmem:[%s1965_s4 + $0xb0] sm:$0xff] %v1478_v48   ;;  %v515_v52 = vpop.f32.mrf.mxu0  ;;  %v555_v53 = vpop.f32.mrf.mxu1  ;;  %v883_v60 = vmul.f32 %v1730_v42, %v593_v50  ;;  %v899_v61 = vmul.f32 %v1730_v42, %v633_v51 }
 0x117   :  { %1554 = vst [vmem:[%s1965_s4 + $0xf0] sm:$0xff] %v1518_v49   ;;  %v852_v56 = vmul.f32 %v1730_v42, %v515_v52  ;;  %v868_v57 = vmul.f32 %v1730_v42, %v555_v53 }
 0x118   :  { %v951_v6 = vadd.f32 %v1736_v44, %v883_v60  ;;  %v967_v7 = vadd.f32 %v1736_v44, %v899_v61 }
 0x119   :  { %v920_v58 = vadd.f32 %v1736_v44, %v852_v56  ;;  %v936_v59 = vadd.f32 %v1736_v44, %v868_v57 }
 0x11a   :  { %v1015_v12 = vmax.f32 %v951_v6, 0.0  ;;  %v1031_v13 = vmax.f32 %v967_v7, 0.0 }
 0x11b   :  { %v984_v0 = vmax.f32 %v920_v58, 0.0  ;;  %v1000_v1 = vmax.f32 %v936_v59, 0.0 }
 0x11d   :  { %v1403_v2 = vpack.c.bf16 %v984_v0, %v983_v62  ;;  %v1443_v3 = vpack.c.bf16 %v1000_v1, %v999_v63  ;;  %v595_v4 = vpop.f32.mrf.mxu2  ;;  %v635_v5 = vpop.f32.mrf.mxu3 }
 0x11e   :  { %v884_v8 = vmul.f32 %v1730_v42, %v595_v4  ;;  %v900_v9 = vmul.f32 %v1730_v42, %v635_v5 }
 0x11f   :  { %1531 = vst [vmem:[%s1965_s4 + $0x38] sm:$0xff] %v1403_v2  }
 0x120   :  { %1539 = vst [vmem:[%s1965_s4 + $0x78] sm:$0xff] %v1443_v3   ;;  %v952_v10 = vadd.f32 %v1736_v44, %v884_v8  ;;  %v968_v11 = vadd.f32 %v1736_v44, %v900_v9 }
 0x122   :  { %v1016_v14 = vmax.f32 %v952_v10, 0.0  ;;  %v1032_v15 = vmax.f32 %v968_v11, 0.0 }
 0x124   :  { %v1483_v16 = vpack.c.bf16 %v1016_v14, %v1015_v12  ;;  %v1523_v17 = vpack.c.bf16 %v1032_v15, %v1031_v13 }
 0x126   :  { %1547 = vst [vmem:[%s1965_s4 + $0xb8] sm:$0xff] %v1483_v16  }
 0x127   :  { %1555 = vst [vmem:[%s1965_s4 + $0xf8] sm:$0xff] %v1523_v17  }

// kernel: bottleneck_forward.5
= control target key start
LH: loop header
LB: loop body
LE: loop exit
PB: predicated region body
PF: predicated region fallthrough
CT: control target
= control target key end

     0   :  { %s1878_s15 = smov 0   ;;  %s1880_s16 = smov 0   ;;  %s2175_s0 = inlined_call_operand.vmem [shape: bf16[8,9,9,128], index: 0, kind: input, shape index: {}]   ;;  %s2176_s1 = inlined_call_operand.vmem [shape: bf16[9,128,128], index: 1, kind: input, shape index: {}]   ;;  %s2177_s2 = inlined_call_operand.vmem [shape: f32[1,128], index: 2, kind: input, shape index: {}]   ;;  %s2178_s3 = inlined_call_operand.vmem [shape: f32[1,128], index: 3, kind: input, shape index: {}]   ;;  %s2179_s4 = inlined_call_operand.vmem [shape: bf16[2,8,8,128], index: 4, kind: output, shape index: {}]  }
   0x1   :  { %s1882_s17 = smov 0   ;;  %s1884_s18 = smov 0  }
   0x2   :  { %s1886_s19 = smov 0  }
   0x3 LB: > { %s29_s20 = sadd.s32 1, %s1843_s17  ;;  %s33_s21 = sadd.s32 1, %s1847_s18  ;;  %s1851_s19 = sphi %s1886_s19, %s14_s19   ;;  %s1847_s18 = sphi %s1884_s18, %s2183_s18   ;;  %s1843_s17 = sphi %s1882_s17, %s2182_s17   ;;  %s1839_s16 = sphi %s1880_s16, %s2181_s16   ;;  %s1835_s15 = sphi %s1878_s15, %s2180_s15  }
   0x4   : > { %p31_p0 = scmp.ge.s32.totalorder %s29_s20, 8  ;;  %p1235_p1 = scmp.ge.s32.totalorder %s1851_s19, 1 }
   0x5   : > { %p212_p2 = scmp.lt.s32.totalorder %s1851_s19, 17 }
   0x6   : > { %s2185_s20 = smov (%p31_p0, %s29_s20), 0  ;;  %s2187_s21 = smov (!%p31_p0, %s33_s21), %s1847_s18 }
   0x7   : > { %p213_p3 = pnand %p1235_p1, %p212_p2  ;;  %p35_p4 = scmp.ge.s32.totalorder %s2187_s21, 2 }
   0x8   : > { %s1236_s28 = sshll.u32 (!%p213_p3), %s1839_s16, 2  ;;  %s1690_s6 = sshll.u32 (!%p213_p3), %s1835_s15, 3 }
   0x9   : > { %s2189_s21 = smov (%p35_p4, %s2187_s21), 0  ;;  %216 = sbr.rel (%p213_p3) target bundleno = 247 (0xf7), region = 36 }
   0xa   : > { %p256_p5 = scmp.lt.s32.totalorder (!%p213_p3), %s1236_s28, 7  ;;  %p272_p6 = scmp.lt.s32.totalorder (!%p213_p3), %s1839_s16, 1 }
   0xb   : > { %p274_p7 = scmp.lt.s32.totalorder (!%p213_p3), %s1835_s15, 7 }
   0xe   : > { %v1707_v0 = vld [vmem:[%s2176_s1 + $0x78] sm:$0xff]  ;;  %v1706_v4 = vld [vmem:[%s2176_s1 + $0x70] sm:$0xff]  ;;  %s2191_s28 = smov (!%p256_p5, %s1236_s28), 7  ;;  %v1705_v8 = vld [vmem:[%s2176_s1 + $0x68] sm:$0xff]  ;;  %s2193_s16 = smov (!%p272_p6, %s1839_s16), 1 }
   0xf   : > { %v1716_v1 = vld [vmem:[%s2176_s1 + $0xb8] sm:$0xff]  ;;  %372 = vmatpush.bf16.msra.mxu0 %v1707_v0  ;;  %v1715_v5 = vld [vmem:[%s2176_s1 + $0xb0] sm:$0xff]  ;;  %s1770_s13 = smul.u32 72, %s2191_s28  ;;  %v1714_v9 = vld [vmem:[%s2176_s1 + $0xa8] sm:$0xff]  ;;  %s2195_s15 = smov (!%p274_p7, %s1835_s15), 7 }
  0x10   : > { %v1725_v2 = vld [vmem:[%s2176_s1 + $0xf8] sm:$0xff]  ;;  %526 = vmatpush.bf16.msra.mxu2 %v1716_v1  ;;  %v1724_v6 = vld [vmem:[%s2176_s1 + $0xf0] sm:$0xff]  ;;  %v1723_v10 = vld [vmem:[%s2176_s1 + $0xe8] sm:$0xff] }
  0x11   : > { %v1698_v3 = vld [vmem:[%s2176_s1 + $0x38] sm:$0xff]  ;;  %609 = vmatpush.bf16.msra.mxu3 %v1725_v2  ;;  %v1697_v7 = vld [vmem:[%s2176_s1 + $0x30] sm:$0xff]  ;;  %v1696_v11 = vld [vmem:[%s2176_s1 + $0x28] sm:$0xff]  ;;  %s260_s5 = scalar_lea.vmem %s2175_s0, %s1770_s13 }
  0x12   : > { %433 = vmatpush.bf16.msra.mxu1 %v1698_v3  ;;  %v1704_v12 = vld [vmem:[%s2176_s1 + $0x60] sm:$0xff]  ;;  %s1965_s13 = scalar_lea.vmem %s260_s5, %s1690_s6  ;;  %v1703_v16 = vld [vmem:[%s2176_s1 + $0x58] sm:$0xff]  ;;  %v1702_v22 = vld [vmem:[%s2176_s1 + $0x50] sm:$0xff] }
  0x13   : > { %373 = vmatpush.bf16.msra.mxu0 %v1706_v4  ;;  %v1713_v13 = vld [vmem:[%s2176_s1 + $0xa0] sm:$0xff]  ;;  %v1712_v17 = vld [vmem:[%s2176_s1 + $0x98] sm:$0xff]  ;;  %v1711_v23 = vld [vmem:[%s2176_s1 + $0x90] sm:$0xff] }
  0x14   : > { %527 = vmatpush.bf16.msra.mxu2 %v1715_v5  ;;  %v1722_v14 = vld [vmem:[%s2176_s1 + $0xe0] sm:$0xff]  ;;  %v1721_v18 = vld [vmem:[%s2176_s1 + $0xd8] sm:$0xff]  ;;  %v1720_v25 = vld [vmem:[%s2176_s1 + $0xd0] sm:$0xff] }
  0x15   : > { %610 = vmatpush.bf16.msra.mxu3 %v1724_v6  ;;  %v1695_v15 = vld [vmem:[%s2176_s1 + $0x20] sm:$0xff]  ;;  %v1694_v19 = vld [vmem:[%s2176_s1 + $0x18] sm:$0xff]  ;;  %v1693_v26 = vld [vmem:[%s2176_s1 + $0x10] sm:$0xff] }
  0x16   : > { %434 = vmatpush.bf16.msra.mxu1 %v1697_v7  ;;  %v1343_v20 = vld [vmem:[%s1965_s13] sm:$0xf]  ;;  %v1708_v21 = vld [vmem:[%s1965_s13] sm:$0x10]  ;;  %v1701_v27 = vld [vmem:[%s2176_s1 + $0x48] sm:$0xff] }
  0x17   : > { %374 = vmatpush.bf16.msra.mxu0 %v1705_v8  ;;  %v1344_v24 = vor.u32 %v1708_v21, %v1343_v20  ;;  %v1710_v28 = vld [vmem:[%s2176_s1 + $0x88] sm:$0xff]  ;;  %v1700_v32 = vld [vmem:[%s2176_s1 + $0x40] sm:$0xff]  ;;  %v1734_v36 = vld [vmem:[%s2176_s1 + $0x138] sm:$0xff] }
  0x18   : > { %528 = vmatpush.bf16.msra.mxu2 %v1714_v9  ;;  %v1719_v30 = vld [vmem:[%s2176_s1 + $0xc8] sm:$0xff]  ;;  %v1709_v33 = vld [vmem:[%s2176_s1 + $0x80] sm:$0xff]  ;;  %v1751_v37 = vld [vmem:[%s2176_s1 + $0x1b8] sm:$0xff] }
  0x19   : > { %611 = vmatpush.bf16.msra.mxu3 %v1723_v10  ;;  %v473_v29 = vshll.u32 %v1344_v24, 16  ;;  %v1692_v31 = vld [vmem:[%s2176_s1 + $0x8] sm:$0xff]  ;;  %v471_v34 = vshrl.u32 %v1344_v24, 16  ;;  %v1718_v38 = vld [vmem:[%s2176_s1 + $0xc0] sm:$0xff]  ;;  %v1760_v40 = vld [vmem:[%s2176_s1 + $0x1f8] sm:$0xff] }
  0x1a   : > { %435 = vmatpush.bf16.msra.mxu1 %v1696_v11  ;;  %v1691_v39 = vld [vmem:[%s2176_s1] sm:$0xff]  ;;  %v1743_v41 = vld [vmem:[%s2176_s1 + $0x178] sm:$0xff]  ;;  %v1733_v43 = vld [vmem:[%s2176_s1 + $0x130] sm:$0xff] }
  0x1b   : > { %375 = vmatpush.bf16.msra.mxu0 %v1704_v12  ;;  %v475_v35 = vrot.slane %v473_v29, 1  ;;  %v1750_v44 = vld [vmem:[%s2176_s1 + $0x1b0] sm:$0xff]  ;;  %v1244_v45 = vld [vmem:[%s1965_s13 + $0x48] sm:$0xf]  ;;  %v286_v49 = vld [vmem:[%s1965_s13] sm:$0xf] }
  0x1c   : > { %529 = vmatpush.bf16.msra.mxu2 %v1713_v13  ;;  %v1759_v46 = vld [vmem:[%s2176_s1 + $0x1f0] sm:$0xff]  ;;  %v1732_v50 = vld [vmem:[%s2176_s1 + $0x128] sm:$0xff]  ;;  %v1731_v54 = vld [vmem:[%s2176_s1 + $0x120] sm:$0xff] }
  0x1d   : > { %612 = vmatpush.bf16.msra.mxu3 %v1722_v14  ;;  %v476_v42 = vor.u32 %v475_v35, %v471_v34  ;;  %v1742_v47 = vld [vmem:[%s2176_s1 + $0x170] sm:$0xff]  ;;  %v1749_v51 = vld [vmem:[%s2176_s1 + $0x1a8] sm:$0xff]  ;;  %v1748_v55 = vld [vmem:[%s2176_s1 + $0x1a0] sm:$0xff] }
  0x1e   : > { %436 = vmatpush.bf16.msra.mxu1 %v1695_v15  ;;  %v1379_v48 = vld [vmem:[%s1965_s13 + $0x90] sm:$0xf]  ;;  %v1758_v52 = vld [vmem:[%s2176_s1 + $0x1e8] sm:$0xff]  ;;  %v1757_v56 = vld [vmem:[%s2176_s1 + $0x1e0] sm:$0xff] }
  0x1f   : > { %376 = vmatpush.bf16.msra.mxu0 %v1703_v16  ;;  %v1741_v53 = vld [vmem:[%s2176_s1 + $0x168] sm:$0xff]  ;;  %v1740_v57 = vld [vmem:[%s2176_s1 + $0x160] sm:$0xff]  ;;  %v1730_v58 = vld [vmem:[%s2176_s1 + $0x118] sm:$0xff] }
  0x20   : > { %530 = vmatpush.bf16.msra.mxu2 %v1712_v17  ;;  %v1747_v59 = vld [vmem:[%s2176_s1 + $0x198] sm:$0xff]  ;;  %v1499_v62 = vld [vmem:[%s1965_s13 + $0x90] sm:$0xf]  ;;  %v1735_v63 = vld [vmem:[%s1965_s13 + $0x90] sm:$0x10] }
  0x21   : > { %613 = vmatpush.bf16.msra.mxu3 %v1721_v18  ;;  %v1756_v60 = vld [vmem:[%s2176_s1 + $0x1d8] sm:$0xff]  ;;  %v1729_v0 = vld [vmem:[%s2176_s1 + $0x110] sm:$0xff]  ;;  %v1500_v4 = vor.u32 %v1735_v63, %v1499_v62  ;;  %v1728_v5 = vld [vmem:[%s2176_s1 + $0x108] sm:$0xff] }
  0x22   : > { %437 = vmatpush.bf16.msra.mxu1 %v1694_v19  ;;  %v1739_v61 = vld [vmem:[%s2176_s1 + $0x158] sm:$0xff]  ;;  %v1746_v1 = vld [vmem:[%s2176_s1 + $0x190] sm:$0xff]  ;;  %v1745_v6 = vld [vmem:[%s2176_s1 + $0x188] sm:$0xff] }
  0x23   : > { %377 = vmatpush.bf16.msra.mxu0 %v1702_v22  ;;  %v1755_v2 = vld [vmem:[%s2176_s1 + $0x1d0] sm:$0xff]  ;;  %v1754_v7 = vld [vmem:[%s2176_s1 + $0x1c8] sm:$0xff]  ;;  %v733_v9 = vshll.u32 %v1500_v4, 16  ;;  %v1727_v10 = vld [vmem:[%s2176_s1 + $0x100] sm:$0xff]  ;;  %v731_v15 = vshrl.u32 %v1500_v4, 16 }
  0x24   : > { %531 = vmatpush.bf16.msra.mxu2 %v1711_v23  ;;  %v1738_v3 = vld [vmem:[%s2176_s1 + $0x150] sm:$0xff]  ;;  %v1737_v8 = vld [vmem:[%s2176_s1 + $0x148] sm:$0xff]  ;;  %v1744_v11 = vld [vmem:[%s2176_s1 + $0x180] sm:$0xff] }
  0x25   : > { %614 = vmatpush.bf16.msra.mxu3 %v1720_v25  ;;  %v1769_v12 = vld [vmem:[%s2176_s1 + $0x238] sm:$0xff]  ;;  %v1753_v13 = vld [vmem:[%s2176_s1 + $0x1c0] sm:$0xff]  ;;  %v735_v16 = vrot.slane %v733_v9, 1  ;;  %v1534_v17 = vld [vmem:[%s1965_s13 + $0x8] sm:$0xf] }
  0x26   : > { %438 = vmatpush.bf16.msra.mxu1 %v1693_v26  ;;  %v1736_v14 = vld [vmem:[%s2176_s1 + $0x140] sm:$0xff]  ;;  %v1430_v18 = vld [vmem:[%s1965_s13 + $0xd8] sm:$0xf]  ;;  %v1768_v19 = vld [vmem:[%s2176_s1 + $0x230] sm:$0xff] }
  0x27   : > { %378 = vmatpush.bf16.msra.mxu0 %v1701_v27  ;;  %v1585_v20 = vld [vmem:[%s1965_s13 + $0x50] sm:$0xf]  ;;  %v736_v21 = vor.u32 %v735_v16, %v731_v15  ;;  %v1767_v22 = vld [vmem:[%s2176_s1 + $0x228] sm:$0xff]  ;;  %v1766_v23 = vld [vmem:[%s2176_s1 + $0x220] sm:$0xff] }
  0x28   : > { %532 = vmatpush.bf16.msra.mxu2 %v1710_v28  ;;  %v1765_v24 = vld [vmem:[%s2176_s1 + $0x218] sm:$0xff]  ;;  %v1654_v25 = vld [vmem:[%s1965_s13 + $0x8] sm:$0xf]  ;;  %v1761_v26 = vld [vmem:[%s1965_s13 + $0x8] sm:$0x10]  ;;  %s1238_s13 = sshll.u32 %s2193_s16, 3 }
  0x29   : > { %615 = vmatpush.bf16.msra.mxu3 %v1719_v30  ;;  %v1655_v27 = vor.u32 %v1761_v26, %v1654_v25  ;;  %v1764_v28 = vld [vmem:[%s2176_s1 + $0x210] sm:$0xff]  ;;  %v1763_v30 = vld [vmem:[%s2176_s1 + $0x208] sm:$0xff]  ;;  %s280_s5 = sadd.s32 %s1238_s13, %s2195_s15 }
  0x2a   : > { %439 = vmatpush.bf16.msra.mxu1 %v1692_v31  ;;  %s1239_s6 = sshll.u32 %s280_s5, 2 }
  0x2b   : > { %379 = vmatpush.bf16.msra.mxu0 %v1700_v32  ;;  %v994_v29 = vshll.u32 %v1655_v27, 16  ;;  %v992_v31 = vshrl.u32 %v1655_v27, 16  ;;  %s282_s9 = scalar_lea.vmem %s2179_s4, %s1239_s6 }
  0x2c   : > { %533 = vmatpush.bf16.msra.mxu2 %v1709_v33  ;;  %v1762_v33 = vld [vmem:[%s2176_s1 + $0x200] sm:$0xff] }
  0x2d   : > { %616 = vmatpush.bf16.msra.mxu3 %v1718_v38  ;;  %v996_v32 = vrot.slane %v994_v29, 1 }
  0x2e   : > { %440 = vmatpush.bf16.msra.mxu1 %v1691_v39  ;;  %380 = vmatmul.bf16.vlgmr.msra.gmra.mxu0 %v1244_v45 }
  0x2f   : > { %692 = vmatpush.bf16.msrb.mxu0 %v1734_v36  ;;  %534 = vmatmul.bf16.vlgmr.msra.gmra.mxu2 %v476_v42  ;;  %v997_v34 = vor.u32 %v996_v32, %v992_v31 }
  0x30   : > { %870 = vmatpush.bf16.msrb.mxu2 %v1751_v37  ;;  %617 = vmatmul.bf16.vlgmr.msra.gmra.mxu3 %v1379_v48 }
  0x31   : > { %953 = vmatpush.bf16.msrb.mxu3 %v1760_v40  ;;  %441 = vmatmul.bf16.vlgmr.msra.gmra.mxu1 %v286_v49 }
  0x32   : > { %786 = vmatpush.bf16.msrb.mxu1 %v1743_v41 }
  0x33   : > { %693 = vmatpush.bf16.msrb.mxu0 %v1733_v43 }
  0x34   : > { %871 = vmatpush.bf16.msrb.mxu2 %v1750_v44 }
  0x35   : > { %954 = vmatpush.bf16.msrb.mxu3 %v1759_v46 }
  0x36   : > { %787 = vmatpush.bf16.msrb.mxu1 %v1742_v47 }
  0x37   : > { %694 = vmatpush.bf16.msrb.mxu0 %v1732_v50 }
  0x38   : > { %872 = vmatpush.bf16.msrb.mxu2 %v1749_v51 }
  0x39   : > { %955 = vmatpush.bf16.msrb.mxu3 %v1758_v52 }
  0x3a   : > { %788 = vmatpush.bf16.msrb.mxu1 %v1741_v53 }
  0x3b   : > { %695 = vmatpush.bf16.msrb.mxu0 %v1731_v54 }
  0x3c   : > { %873 = vmatpush.bf16.msrb.mxu2 %v1748_v55 }
  0x3d   : > { %956 = vmatpush.bf16.msrb.mxu3 %v1757_v56 }
  0x3e   : > { %789 = vmatpush.bf16.msrb.mxu1 %v1740_v57 }
  0x3f   : > { %696 = vmatpush.bf16.msrb.mxu0 %v1730_v58  ;;  %v1811_v58 = vld [vmem:[%s2177_s2] ss:$0 sm:$0xff] }
  0x40   : > { %874 = vmatpush.bf16.msrb.mxu2 %v1747_v59 }
  0x41   : > { %957 = vmatpush.bf16.msrb.mxu3 %v1756_v60 }
  0x42   : > { %790 = vmatpush.bf16.msrb.mxu1 %v1739_v61  ;;  %v1812_v61 = vld [vmem:[%s2178_s3] ss:$0 sm:$0xff] }
  0x43   : > { %697 = vmatpush.bf16.msrb.mxu0 %v1729_v0 }
  0x44   : > { %875 = vmatpush.bf16.msrb.mxu2 %v1746_v1 }
  0x45   : > { %958 = vmatpush.bf16.msrb.mxu3 %v1755_v2 }
  0x46   : > { %791 = vmatpush.bf16.msrb.mxu1 %v1738_v3 }
  0x47   : > { %698 = vmatpush.bf16.msrb.mxu0 %v1728_v5 }
  0x48   : > { %876 = vmatpush.bf16.msrb.mxu2 %v1745_v6 }
  0x49   : > { %959 = vmatpush.bf16.msrb.mxu3 %v1754_v7 }
  0x4a   : > { %792 = vmatpush.bf16.msrb.mxu1 %v1737_v8 }
  0x4b   : > { %699 = vmatpush.bf16.msrb.mxu0 %v1727_v10 }
  0x4c   : > { %877 = vmatpush.bf16.msrb.mxu2 %v1744_v11 }
  0x4d   : > { %960 = vmatpush.bf16.msrb.mxu3 %v1753_v13 }
  0x4e   : > { %793 = vmatpush.bf16.msrb.mxu1 %v1736_v14  ;;  %700 = vmatmul.bf16.vlgmr.msrb.gmra.mxu0 %v1430_v18 }
  0x4f   : > { %1047 = vmatpush.bf16.msra.mxu0 %v1769_v12  ;;  %878 = vmatmul.bf16.vlgmr.msrb.gmra.mxu2 %v1534_v17 }
  0x50   : > { %961 = vmatmul.bf16.vlgmr.msrb.gmra.mxu3 %v1585_v20 }
  0x51   : > { %794 = vmatmul.bf16.vlgmr.msrb.gmra.mxu1 %v736_v21 }
  0x53   : > { %1048 = vmatpush.bf16.msra.mxu0 %v1768_v19 }
  0x57   : > { %1049 = vmatpush.bf16.msra.mxu0 %v1767_v22 }
  0x5b   : > { %1050 = vmatpush.bf16.msra.mxu0 %v1766_v23 }
  0x5f   : > { %1051 = vmatpush.bf16.msra.mxu0 %v1765_v24 }
  0x63   : > { %1052 = vmatpush.bf16.msra.mxu0 %v1764_v28 }
  0x67   : > { %1053 = vmatpush.bf16.msra.mxu0 %v1763_v30 }
  0x6b   : > { %1054 = vmatpush.bf16.msra.mxu0 %v1762_v33 }
  0x6e   : > { %1055 = vmatmul.bf16.vlgmr.msra.gmra.mxu0 %v997_v34 }
  0xab   : > { %v381_v35 = vpop.f32.mrf.mxu0 }
  0xae   : > { %v442_v36 = vpop.f32.mrf.mxu1 }
  0xaf   : > { %v443_v45 = vadd.f32 %v442_v36, %v381_v35 }
  0xb2   : > { %v535_v37 = vpop.f32.mrf.mxu2 }
  0xb3   : > { %v618_v38 = vpop.f32.mrf.mxu3  ;;  %v383_v39 = vpop.f32.mrf.mxu0  ;;  %v539_v47 = vadd.f32 %v535_v37, %v443_v45 }
  0xb5   : > { %v622_v51 = vadd.f32 %v618_v38, %v539_v47 }
  0xb6   : > { %v444_v40 = vpop.f32.mrf.mxu1 }
  0xba   : > { %v537_v41 = vpop.f32.mrf.mxu2 }
  0xbb   : > { %v620_v42 = vpop.f32.mrf.mxu3 }
  0xcb   : > { %v701_v43 = vpop.f32.mrf.mxu0 }
  0xcc   : > { %v705_v53 = vadd.f32 %v701_v43, %v622_v51 }
  0xce   : > { %v795_v44 = vpop.f32.mrf.mxu1 }
  0xcf   : > { %v799_v55 = vadd.f32 %v795_v44, %v705_v53 }
  0xd2   : > { %v879_v46 = vpop.f32.mrf.mxu2 }
  0xd3   : > { %v962_v48 = vpop.f32.mrf.mxu3  ;;  %v703_v49 = vpop.f32.mrf.mxu0  ;;  %v883_v56 = vadd.f32 %v879_v46, %v799_v55 }
  0xd5   : > { %v966_v57 = vadd.f32 %v962_v48, %v883_v56 }
  0xd6   : > { %v797_v50 = vpop.f32.mrf.mxu1 }
  0xda   : > { %v881_v52 = vpop.f32.mrf.mxu2 }
  0xdb   : > { %v964_v54 = vpop.f32.mrf.mxu3 }
  0xeb   : > { %v1056_v59 = vpop.f32.mrf.mxu0 }
  0xec   : > { %v1060_v60 = vadd.f32 %v1056_v59, %v966_v57 }
  0xee   : > { %v1065_v62 = vmul.f32 %v1811_v58, %v1060_v60 }
  0xf0   : > { %v1070_v63 = vadd.f32 %v1812_v61, %v1065_v62 }
  0xf2   : > { %v1071_v0 = vmax.f32 %v1070_v63, 0.0 }
  0xf3   : > { %v1058_v1 = vpop.f32.mrf.mxu0 }
  0xf4   : > { %v1072_v2 = vpack.c.bf16 %v1071_v0, %v1071_v0 }
  0xf6   : > { %1073 = vst [vmem:[%s282_s9] sm:$0xf] %v1072_v2 }
  0xf7 PF: > { %s14_s19 = sadd.s32 1, %s1851_s19   ;;  %s2180_s15 = smov %s1843_s17 }
  0xf8   : > { %p11_p8 = scmp.ge.s32.totalorder %s14_s19, 18   ;;  %s2181_s16 = smov %s1847_s18 }
  0xf9   : > { %s2182_s17 = smov %s2185_s20  ;;  %s2183_s18 = smov %s2189_s21 }
  0xfa   :  { %13 = sbr.rel (!%p11_p8) target bundleno = 3 (0x3), region = 89 }

// kernel: bottleneck_forward.6
= control target key start
LH: loop header
LB: loop body
LE: loop exit
PB: predicated region body
PF: predicated region fallthrough
CT: control target
= control target key end

     0   :  { %s613_s1 = inlined_call_operand.vmem [shape: bf16[128,128], index: 1, kind: input, shape index: {}]   ;;  %s614_s2 = inlined_call_operand.vmem [shape: f32[1,128], index: 2, kind: input, shape index: {}]   ;;  %s615_s3 = inlined_call_operand.vmem [shape: f32[1,128], index: 3, kind: input, shape index: {}]   ;;  %s616_s0 = inlined_call_operand.vmem [shape: bf16[128,128], index: 0, kind: input, shape index: {}]   ;;  %s617_s4 = inlined_call_operand.vmem [shape: bf16[128,128], index: 4, kind: output, shape index: {}]  }
   0x1   :  { %v436_v0 = vld [vmem:[%s613_s1 + $0x38] sm:$0xff]  ;;  %v435_v1 = vld [vmem:[%s613_s1 + $0x30] sm:$0xff]  ;;  %v434_v2 = vld [vmem:[%s613_s1 + $0x28] sm:$0xff] }
   0x2   :  { %181 = vmatpush.bf16.msra.mxu0 %v436_v0  ;;  %484 = vmatpush.bf16.msra.mxu1 %v436_v0  ;;  %v433_v3 = vld [vmem:[%s613_s1 + $0x20] sm:$0xff]  ;;  %v432_v4 = vld [vmem:[%s613_s1 + $0x18] sm:$0xff]  ;;  %v431_v5 = vld [vmem:[%s613_s1 + $0x10] sm:$0xff] }
   0x3   :  { %485 = vmatpush.bf16.msra.mxu2 %v436_v0  ;;  %486 = vmatpush.bf16.msra.mxu3 %v436_v0  ;;  %v430_v6 = vld [vmem:[%s613_s1 + $0x8] sm:$0xff]  ;;  %v429_v7 = vld [vmem:[%s613_s1] sm:$0xff]  ;;  %v423_v9 = vld [vmem:[%s616_s0 + $0x10] sm:$0xff] }
   0x4   :  { %v421_v8 = vld [vmem:[%s616_s0] sm:$0xff]  ;;  %v427_v11 = vld [vmem:[%s616_s0 + $0x30] sm:$0xff]  ;;  %v422_v12 = vld [vmem:[%s616_s0 + $0x8] sm:$0xff] }
   0x5   :  { %v425_v10 = vld [vmem:[%s616_s0 + $0x20] sm:$0xff]  ;;  %v424_v13 = vld [vmem:[%s616_s0 + $0x18] sm:$0xff]  ;;  %v426_v14 = vld [vmem:[%s616_s0 + $0x28] sm:$0xff] }
   0x6   :  { %182 = vmatpush.bf16.msra.mxu0 %v435_v1  ;;  %487 = vmatpush.bf16.msra.mxu1 %v435_v1  ;;  %v428_v15 = vld [vmem:[%s616_s0 + $0x38] sm:$0xff]  ;;  %v508_v18 = vld [vmem:[%s614_s2] ss:$0 sm:$0xff] }
   0x7   :  { %488 = vmatpush.bf16.msra.mxu2 %v435_v1  ;;  %489 = vmatpush.bf16.msra.mxu3 %v435_v1  ;;  %v509_v20 = vld [vmem:[%s615_s3] ss:$0 sm:$0xff] }
   0xa   :  { %183 = vmatpush.bf16.msra.mxu0 %v434_v2  ;;  %490 = vmatpush.bf16.msra.mxu1 %v434_v2 }
   0xb   :  { %491 = vmatpush.bf16.msra.mxu2 %v434_v2  ;;  %492 = vmatpush.bf16.msra.mxu3 %v434_v2 }
   0xe   :  { %184 = vmatpush.bf16.msra.mxu0 %v433_v3  ;;  %493 = vmatpush.bf16.msra.mxu1 %v433_v3 }
   0xf   :  { %494 = vmatpush.bf16.msra.mxu2 %v433_v3  ;;  %495 = vmatpush.bf16.msra.mxu3 %v433_v3 }
  0x12   :  { %185 = vmatpush.bf16.msra.mxu0 %v432_v4  ;;  %496 = vmatpush.bf16.msra.mxu1 %v432_v4 }
  0x13   :  { %497 = vmatpush.bf16.msra.mxu2 %v432_v4  ;;  %498 = vmatpush.bf16.msra.mxu3 %v432_v4 }
  0x16   :  { %186 = vmatpush.bf16.msra.mxu0 %v431_v5  ;;  %499 = vmatpush.bf16.msra.mxu1 %v431_v5 }
  0x17   :  { %500 = vmatpush.bf16.msra.mxu2 %v431_v5  ;;  %501 = vmatpush.bf16.msra.mxu3 %v431_v5 }
  0x1a   :  { %187 = vmatpush.bf16.msra.mxu0 %v430_v6  ;;  %502 = vmatpush.bf16.msra.mxu1 %v430_v6 }
  0x1b   :  { %503 = vmatpush.bf16.msra.mxu2 %v430_v6  ;;  %504 = vmatpush.bf16.msra.mxu3 %v430_v6 }
  0x1e   :  { %188 = vmatpush.bf16.msra.mxu0 %v429_v7  ;;  %505 = vmatpush.bf16.msra.mxu1 %v429_v7 }
  0x1f   :  { %506 = vmatpush.bf16.msra.mxu2 %v429_v7  ;;  %507 = vmatpush.bf16.msra.mxu3 %v429_v7 }
  0x21   :  { %189 = vmatmul.bf16.vlgmr.msra.gmra.mxu0 %v421_v8  ;;  %199 = vmatmul.bf16.vlgmr.msra.gmra.mxu1 %v423_v9 }
  0x22   :  { %209 = vmatmul.bf16.vlgmr.msra.gmra.mxu2 %v425_v10  ;;  %219 = vmatmul.bf16.vlgmr.msra.gmra.mxu3 %v427_v11 }
  0x31   :  { %194 = vmatmul.bf16.gmra.mxu0 %v422_v12  ;;  %204 = vmatmul.bf16.gmra.mxu1 %v424_v13 }
  0x32   :  { %214 = vmatmul.bf16.gmra.mxu2 %v426_v14  ;;  %224 = vmatmul.bf16.gmra.mxu3 %v428_v15 }
  0x9e   :  { %v190_v16 = vpop.f32.mrf.mxu0  ;;  %v200_v17 = vpop.f32.mrf.mxu1 }
  0x9f   :  { %v285_v19 = vmul.f32 %v508_v18, %v190_v16  ;;  %v289_v21 = vmul.f32 %v508_v18, %v200_v17 }
  0xa1   :  { %v305_v28 = vadd.f32 %v509_v20, %v285_v19  ;;  %v309_v29 = vadd.f32 %v509_v20, %v289_v21 }
  0xa5   :  { %v210_v22 = vpop.f32.mrf.mxu2  ;;  %v220_v23 = vpop.f32.mrf.mxu3 }
  0xa6   :  { %v192_v24 = vpop.f32.mrf.mxu0  ;;  %v202_v25 = vpop.f32.mrf.mxu1  ;;  %v293_v34 = vmul.f32 %v508_v18, %v210_v22  ;;  %v297_v35 = vmul.f32 %v508_v18, %v220_v23 }
  0xa7   :  { %v286_v26 = vmul.f32 %v508_v18, %v192_v24  ;;  %v290_v27 = vmul.f32 %v508_v18, %v202_v25 }
  0xa8   :  { %v313_v42 = vadd.f32 %v509_v20, %v293_v34  ;;  %v317_v43 = vadd.f32 %v509_v20, %v297_v35 }
  0xa9   :  { %v306_v30 = vadd.f32 %v509_v20, %v286_v26  ;;  %v310_v31 = vadd.f32 %v509_v20, %v290_v27 }
  0xab   :  { %v440_v32 = vpack.c.bf16 %v306_v30, %v305_v28  ;;  %v450_v33 = vpack.c.bf16 %v310_v31, %v309_v29 }
  0xad   :  { %441 = vst [vmem:[%s617_s4] sm:$0xff] %v440_v32   ;;  %v212_v36 = vpop.f32.mrf.mxu2  ;;  %v222_v37 = vpop.f32.mrf.mxu3 }
  0xae   :  { %478 = vst [vmem:[%s617_s4 + $0x10] sm:$0xff] %v450_v33   ;;  %v294_v38 = vmul.f32 %v508_v18, %v212_v36  ;;  %v298_v39 = vmul.f32 %v508_v18, %v222_v37  ;;  %v195_v40 = vpop.f32.mrf.mxu0  ;;  %v205_v41 = vpop.f32.mrf.mxu1 }
  0xaf   :  { %v287_v48 = vmul.f32 %v508_v18, %v195_v40  ;;  %v291_v49 = vmul.f32 %v508_v18, %v205_v41 }
  0xb0   :  { %v314_v44 = vadd.f32 %v509_v20, %v294_v38  ;;  %v318_v45 = vadd.f32 %v509_v20, %v298_v39 }
  0xb1   :  { %v307_v56 = vadd.f32 %v509_v20, %v287_v48  ;;  %v311_v57 = vadd.f32 %v509_v20, %v291_v49 }
  0xb2   :  { %v460_v46 = vpack.c.bf16 %v314_v44, %v313_v42  ;;  %v470_v47 = vpack.c.bf16 %v318_v45, %v317_v43 }
  0xb4   :  { %480 = vst [vmem:[%s617_s4 + $0x20] sm:$0xff] %v460_v46  }
  0xb5   :  { %482 = vst [vmem:[%s617_s4 + $0x30] sm:$0xff] %v470_v47   ;;  %v215_v50 = vpop.f32.mrf.mxu2  ;;  %v225_v51 = vpop.f32.mrf.mxu3 }
  0xb6   :  { %v197_v52 = vpop.f32.mrf.mxu0  ;;  %v207_v53 = vpop.f32.mrf.mxu1  ;;  %v295_v62 = vmul.f32 %v508_v18, %v215_v50  ;;  %v299_v63 = vmul.f32 %v508_v18, %v225_v51 }
  0xb7   :  { %v288_v54 = vmul.f32 %v508_v18, %v197_v52  ;;  %v292_v55 = vmul.f32 %v508_v18, %v207_v53 }
  0xb8   :  { %v315_v4 = vadd.f32 %v509_v20, %v295_v62  ;;  %v319_v5 = vadd.f32 %v509_v20, %v299_v63 }
  0xb9   :  { %v308_v58 = vadd.f32 %v509_v20, %v288_v54  ;;  %v312_v59 = vadd.f32 %v509_v20, %v292_v55 }
  0xbb   :  { %v445_v60 = vpack.c.bf16 %v308_v58, %v307_v56  ;;  %v455_v61 = vpack.c.bf16 %v312_v59, %v311_v57 }
  0xbd   :  { %477 = vst [vmem:[%s617_s4 + $0x8] sm:$0xff] %v445_v60   ;;  %v217_v0 = vpop.f32.mrf.mxu2  ;;  %v227_v1 = vpop.f32.mrf.mxu3 }
  0xbe   :  { %479 = vst [vmem:[%s617_s4 + $0x18] sm:$0xff] %v455_v61   ;;  %v296_v2 = vmul.f32 %v508_v18, %v217_v0  ;;  %v300_v3 = vmul.f32 %v508_v18, %v227_v1 }
  0xc0   :  { %v316_v6 = vadd.f32 %v509_v20, %v296_v2  ;;  %v320_v7 = vadd.f32 %v509_v20, %v300_v3 }
  0xc2   :  { %v465_v8 = vpack.c.bf16 %v316_v6, %v315_v4  ;;  %v475_v9 = vpack.c.bf16 %v320_v7, %v319_v5 }
  0xc4   :  { %481 = vst [vmem:[%s617_s4 + $0x28] sm:$0xff] %v465_v8  }
  0xc5   :  { %483 = vst [vmem:[%s617_s4 + $0x38] sm:$0xff] %v475_v9  }

// kernel: bottleneck_forward.7
= control target key start
LH: loop header
LB: loop body
LE: loop exit
PB: predicated region body
PF: predicated region fallthrough
CT: control target
= control target key end

     0   :  { %s745_s1 = inlined_call_operand.vmem [shape: bf16[128,128], index: 1, kind: input, shape index: {}]   ;;  %s746_s2 = inlined_call_operand.vmem [shape: f32[1,128], index: 2, kind: input, shape index: {}]   ;;  %s747_s3 = inlined_call_operand.vmem [shape: f32[1,128], index: 3, kind: input, shape index: {}]   ;;  %s748_s0 = inlined_call_operand.vmem [shape: bf16[128,128], index: 0, kind: input, shape index: {}]   ;;  %s749_s4 = inlined_call_operand.vmem [shape: bf16[128,128], index: 4, kind: input, shape index: {}]   ;;  %s750_s5 = inlined_call_operand.vmem [shape: f32[128,128], index: 5, kind: output, shape index: {}]  }
   0x1   :  { %v487_v0 = vld [vmem:[%s745_s1 + $0x38] sm:$0xff]  ;;  %v486_v1 = vld [vmem:[%s745_s1 + $0x30] sm:$0xff]  ;;  %v485_v2 = vld [vmem:[%s745_s1 + $0x28] sm:$0xff] }
   0x2   :  { %184 = vmatpush.bf16.msra.mxu0 %v487_v0  ;;  %527 = vmatpush.bf16.msra.mxu1 %v487_v0  ;;  %v484_v3 = vld [vmem:[%s745_s1 + $0x20] sm:$0xff]  ;;  %v483_v4 = vld [vmem:[%s745_s1 + $0x18] sm:$0xff]  ;;  %v482_v5 = vld [vmem:[%s745_s1 + $0x10] sm:$0xff] }
   0x3   :  { %528 = vmatpush.bf16.msra.mxu2 %v487_v0  ;;  %529 = vmatpush.bf16.msra.mxu3 %v487_v0  ;;  %v481_v6 = vld [vmem:[%s745_s1 + $0x8] sm:$0xff]  ;;  %v480_v7 = vld [vmem:[%s745_s1] sm:$0xff]  ;;  %v474_v9 = vld [vmem:[%s748_s0 + $0x10] sm:$0xff] }
   0x4   :  { %v472_v8 = vld [vmem:[%s748_s0] sm:$0xff]  ;;  %v478_v11 = vld [vmem:[%s748_s0 + $0x30] sm:$0xff]  ;;  %v473_v12 = vld [vmem:[%s748_s0 + $0x8] sm:$0xff] }
   0x5   :  { %v476_v10 = vld [vmem:[%s748_s0 + $0x20] sm:$0xff]  ;;  %v475_v13 = vld [vmem:[%s748_s0 + $0x18] sm:$0xff]  ;;  %v477_v14 = vld [vmem:[%s748_s0 + $0x28] sm:$0xff] }
   0x6   :  { %185 = vmatpush.bf16.msra.mxu0 %v486_v1  ;;  %530 = vmatpush.bf16.msra.mxu1 %v486_v1  ;;  %v479_v15 = vld [vmem:[%s748_s0 + $0x38] sm:$0xff]  ;;  %v634_v16 = vld [vmem:[%s746_s2] ss:$0 sm:$0xff]  ;;  %v521_v18 = vld [vmem:[%s749_s4 + $0x10] sm:$0xff]  }
   0x7   :  { %531 = vmatpush.bf16.msra.mxu2 %v486_v1  ;;  %532 = vmatpush.bf16.msra.mxu3 %v486_v1  ;;  %v489_v17 = vld [vmem:[%s749_s4] sm:$0xff]   ;;  %v498_v25 = vunpack.c.l.bf16 %v521_v18  ;;  %v525_v31 = vld [vmem:[%s749_s4 + $0x30] sm:$0xff]   ;;  %v499_v45 = vunpack.c.h.bf16 %v521_v18  ;;  %v520_v56 = vld [vmem:[%s749_s4 + $0x8] sm:$0xff]  }
   0x8   :  { %v645_v19 = vld [vmem:[%s747_s3] ss:$0 sm:$0xff]  ;;  %v490_v23 = vunpack.c.l.bf16 %v489_v17  ;;  %v514_v39 = vunpack.c.l.bf16 %v525_v31  ;;  %v491_v43 = vunpack.c.h.bf16 %v489_v17  ;;  %v522_v57 = vld [vmem:[%s749_s4 + $0x18] sm:$0xff]   ;;  %v515_v1 = vunpack.c.h.bf16 %v525_v31  ;;  %v524_v17 = vld [vmem:[%s749_s4 + $0x28] sm:$0xff]  }
   0x9   :  { %v523_v30 = vld [vmem:[%s749_s4 + $0x20] sm:$0xff]   ;;  %v526_v18 = vld [vmem:[%s749_s4 + $0x38] sm:$0xff]  }
   0xa   :  { %186 = vmatpush.bf16.msra.mxu0 %v485_v2  ;;  %533 = vmatpush.bf16.msra.mxu1 %v485_v2  ;;  %v506_v37 = vunpack.c.l.bf16 %v523_v30  ;;  %v507_v63 = vunpack.c.h.bf16 %v523_v30 }
   0xb   :  { %534 = vmatpush.bf16.msra.mxu2 %v485_v2  ;;  %535 = vmatpush.bf16.msra.mxu3 %v485_v2 }
   0xe   :  { %187 = vmatpush.bf16.msra.mxu0 %v484_v3  ;;  %536 = vmatpush.bf16.msra.mxu1 %v484_v3 }
   0xf   :  { %537 = vmatpush.bf16.msra.mxu2 %v484_v3  ;;  %538 = vmatpush.bf16.msra.mxu3 %v484_v3 }
  0x12   :  { %188 = vmatpush.bf16.msra.mxu0 %v483_v4  ;;  %539 = vmatpush.bf16.msra.mxu1 %v483_v4 }
  0x13   :  { %540 = vmatpush.bf16.msra.mxu2 %v483_v4  ;;  %541 = vmatpush.bf16.msra.mxu3 %v483_v4 }
  0x16   :  { %189 = vmatpush.bf16.msra.mxu0 %v482_v5  ;;  %542 = vmatpush.bf16.msra.mxu1 %v482_v5 }
  0x17   :  { %543 = vmatpush.bf16.msra.mxu2 %v482_v5  ;;  %544 = vmatpush.bf16.msra.mxu3 %v482_v5  ;;  %v494_v5 = vunpack.c.l.bf16 %v520_v56 }
  0x1a   :  { %190 = vmatpush.bf16.msra.mxu0 %v481_v6  ;;  %545 = vmatpush.bf16.msra.mxu1 %v481_v6 }
  0x1b   :  { %546 = vmatpush.bf16.msra.mxu2 %v481_v6  ;;  %547 = vmatpush.bf16.msra.mxu3 %v481_v6 }
  0x1e   :  { %191 = vmatpush.bf16.msra.mxu0 %v480_v7  ;;  %548 = vmatpush.bf16.msra.mxu1 %v480_v7 }
  0x1f   :  { %549 = vmatpush.bf16.msra.mxu2 %v480_v7  ;;  %550 = vmatpush.bf16.msra.mxu3 %v480_v7  ;;  %v502_v7 = vunpack.c.l.bf16 %v522_v57 }
  0x21   :  { %192 = vmatmul.bf16.vlgmr.msra.gmra.mxu0 %v472_v8  ;;  %202 = vmatmul.bf16.vlgmr.msra.gmra.mxu1 %v474_v9 }
  0x22   :  { %212 = vmatmul.bf16.vlgmr.msra.gmra.mxu2 %v476_v10  ;;  %222 = vmatmul.bf16.vlgmr.msra.gmra.mxu3 %v478_v11 }
  0x31   :  { %197 = vmatmul.bf16.gmra.mxu0 %v473_v12  ;;  %207 = vmatmul.bf16.gmra.mxu1 %v475_v13 }
  0x32   :  { %217 = vmatmul.bf16.gmra.mxu2 %v477_v14  ;;  %227 = vmatmul.bf16.gmra.mxu3 %v479_v15 }
  0x9e   :  { %v193_v20 = vpop.f32.mrf.mxu0  ;;  %v203_v21 = vpop.f32.mrf.mxu1 }
  0x9f   :  { %v288_v22 = vmul.f32 %v634_v16, %v193_v20  ;;  %v292_v24 = vmul.f32 %v634_v16, %v203_v21 }
  0xa1   :  { %v308_v26 = vadd.f32 %v645_v19, %v288_v22  ;;  %v312_v27 = vadd.f32 %v645_v19, %v292_v24 }
  0xa3   :  { %v356_v28 = vadd.f32 %v490_v23, %v308_v26  ;;  %v360_v29 = vadd.f32 %v498_v25, %v312_v27  ;;  %v510_v27 = vunpack.c.l.bf16 %v524_v17 }
  0xa5   :  { %v372_v32 = vmax.f32 %v356_v28, 0.0  ;;  %v376_v33 = vmax.f32 %v360_v29, 0.0  ;;  %v213_v34 = vpop.f32.mrf.mxu2  ;;  %v223_v35 = vpop.f32.mrf.mxu3  ;;  %v518_v29 = vunpack.c.l.bf16 %v526_v18 }
  0xa6   :  { %v296_v36 = vmul.f32 %v634_v16, %v213_v34  ;;  %v300_v38 = vmul.f32 %v634_v16, %v223_v35  ;;  %v195_v40 = vpop.f32.mrf.mxu0  ;;  %v205_v41 = vpop.f32.mrf.mxu1  ;;  %v503_v35 = vunpack.c.h.bf16 %v522_v57 }
  0xa7   :  { %388 = vst [vmem:[%s750_s5] sm:$0xff] %v372_v32  ;;  %v289_v42 = vmul.f32 %v634_v16, %v195_v40  ;;  %v293_v44 = vmul.f32 %v634_v16, %v205_v41 }
  0xa8   :  { %392 = vst [vmem:[%s750_s5 + $0x20] sm:$0xff] %v376_v33  ;;  %v316_v46 = vadd.f32 %v645_v19, %v296_v36  ;;  %v320_v47 = vadd.f32 %v645_v19, %v300_v38  ;;  %v495_v33 = vunpack.c.h.bf16 %v520_v56 }
  0xa9   :  { %v309_v48 = vadd.f32 %v645_v19, %v289_v42  ;;  %v313_v49 = vadd.f32 %v645_v19, %v293_v44 }
  0xaa   :  { %v364_v50 = vadd.f32 %v506_v37, %v316_v46  ;;  %v368_v51 = vadd.f32 %v514_v39, %v320_v47 }
  0xab   :  { %v357_v52 = vadd.f32 %v491_v43, %v309_v48  ;;  %v361_v53 = vadd.f32 %v499_v45, %v313_v49 }
  0xac   :  { %v380_v54 = vmax.f32 %v364_v50, 0.0  ;;  %v384_v55 = vmax.f32 %v368_v51, 0.0  ;;  %v511_v51 = vunpack.c.h.bf16 %v524_v17 }
  0xad   :  { %v373_v58 = vmax.f32 %v357_v52, 0.0  ;;  %v377_v59 = vmax.f32 %v361_v53, 0.0  ;;  %v215_v60 = vpop.f32.mrf.mxu2  ;;  %v225_v61 = vpop.f32.mrf.mxu3  ;;  %v519_v53 = vunpack.c.h.bf16 %v526_v18 }
  0xae   :  { %396 = vst [vmem:[%s750_s5 + $0x40] sm:$0xff] %v380_v54  ;;  %v297_v62 = vmul.f32 %v634_v16, %v215_v60  ;;  %v301_v0 = vmul.f32 %v634_v16, %v225_v61  ;;  %v198_v2 = vpop.f32.mrf.mxu0  ;;  %v208_v3 = vpop.f32.mrf.mxu1 }
  0xaf   :  { %400 = vst [vmem:[%s750_s5 + $0x60] sm:$0xff] %v384_v55  ;;  %v290_v4 = vmul.f32 %v634_v16, %v198_v2  ;;  %v294_v6 = vmul.f32 %v634_v16, %v208_v3 }
  0xb0   :  { %389 = vst [vmem:[%s750_s5 + $0x8] sm:$0xff] %v373_v58  ;;  %v317_v8 = vadd.f32 %v645_v19, %v297_v62  ;;  %v321_v9 = vadd.f32 %v645_v19, %v301_v0 }
  0xb1   :  { %393 = vst [vmem:[%s750_s5 + $0x28] sm:$0xff] %v377_v59  ;;  %v310_v10 = vadd.f32 %v645_v19, %v290_v4  ;;  %v314_v11 = vadd.f32 %v645_v19, %v294_v6 }
  0xb2   :  { %v365_v12 = vadd.f32 %v507_v63, %v317_v8  ;;  %v369_v13 = vadd.f32 %v515_v1, %v321_v9 }
  0xb3   :  { %v358_v14 = vadd.f32 %v494_v5, %v310_v10  ;;  %v362_v15 = vadd.f32 %v502_v7, %v314_v11 }
  0xb4   :  { %v381_v20 = vmax.f32 %v365_v12, 0.0  ;;  %v385_v21 = vmax.f32 %v369_v13, 0.0 }
  0xb5   :  { %v374_v22 = vmax.f32 %v358_v14, 0.0  ;;  %v378_v23 = vmax.f32 %v362_v15, 0.0  ;;  %v218_v24 = vpop.f32.mrf.mxu2  ;;  %v228_v25 = vpop.f32.mrf.mxu3 }
  0xb6   :  { %397 = vst [vmem:[%s750_s5 + $0x48] sm:$0xff] %v381_v20  ;;  %v298_v26 = vmul.f32 %v634_v16, %v218_v24  ;;  %v302_v28 = vmul.f32 %v634_v16, %v228_v25  ;;  %v200_v30 = vpop.f32.mrf.mxu0  ;;  %v210_v31 = vpop.f32.mrf.mxu1 }
  0xb7   :  { %401 = vst [vmem:[%s750_s5 + $0x68] sm:$0xff] %v385_v21  ;;  %v291_v32 = vmul.f32 %v634_v16, %v200_v30  ;;  %v295_v34 = vmul.f32 %v634_v16, %v210_v31 }
  0xb8   :  { %390 = vst [vmem:[%s750_s5 + $0x10] sm:$0xff] %v374_v22  ;;  %v318_v36 = vadd.f32 %v645_v19, %v298_v26  ;;  %v322_v37 = vadd.f32 %v645_v19, %v302_v28 }
  0xb9   :  { %394 = vst [vmem:[%s750_s5 + $0x30] sm:$0xff] %v378_v23  ;;  %v311_v38 = vadd.f32 %v645_v19, %v291_v32  ;;  %v315_v39 = vadd.f32 %v645_v19, %v295_v34 }
  0xba   :  { %v366_v40 = vadd.f32 %v510_v27, %v318_v36  ;;  %v370_v41 = vadd.f32 %v518_v29, %v322_v37 }
  0xbb   :  { %v359_v42 = vadd.f32 %v495_v33, %v311_v38  ;;  %v363_v43 = vadd.f32 %v503_v35, %v315_v39 }
  0xbc   :  { %v382_v44 = vmax.f32 %v366_v40, 0.0  ;;  %v386_v45 = vmax.f32 %v370_v41, 0.0 }
  0xbd   :  { %v375_v46 = vmax.f32 %v359_v42, 0.0  ;;  %v379_v47 = vmax.f32 %v363_v43, 0.0  ;;  %v220_v48 = vpop.f32.mrf.mxu2  ;;  %v230_v49 = vpop.f32.mrf.mxu3 }
  0xbe   :  { %398 = vst [vmem:[%s750_s5 + $0x50] sm:$0xff] %v382_v44  ;;  %v299_v50 = vmul.f32 %v634_v16, %v220_v48  ;;  %v303_v52 = vmul.f32 %v634_v16, %v230_v49 }
  0xbf   :  { %402 = vst [vmem:[%s750_s5 + $0x70] sm:$0xff] %v386_v45 }
  0xc0   :  { %391 = vst [vmem:[%s750_s5 + $0x18] sm:$0xff] %v375_v46  ;;  %v319_v54 = vadd.f32 %v645_v19, %v299_v50  ;;  %v323_v55 = vadd.f32 %v645_v19, %v303_v52 }
  0xc1   :  { %395 = vst [vmem:[%s750_s5 + $0x38] sm:$0xff] %v379_v47 }
  0xc2   :  { %v367_v56 = vadd.f32 %v511_v51, %v319_v54  ;;  %v371_v57 = vadd.f32 %v519_v53, %v323_v55 }
  0xc4   :  { %v383_v16 = vmax.f32 %v367_v56, 0.0  ;;  %v387_v58 = vmax.f32 %v371_v57, 0.0 }
  0xc6   :  { %399 = vst [vmem:[%s750_s5 + $0x58] sm:$0xff] %v383_v16 }
  0xc7   :  { %403 = vst [vmem:[%s750_s5 + $0x78] sm:$0xff] %v387_v58 }

</bundles_post_ra>
